<compile_context>
chip_gen: v7x
topology: tpu7x:2x2x1
jax: 0.10.0
libtpu: 0.0.40
codegen_flags: <defaults>
</compile_context>

<pallas_src>
import functools
import math

import jax
import jax.numpy as jnp
from jax.experimental import pallas as pl
from jax.experimental.pallas import tpu as pltpu

EPS = 1e-5                       # PyTorch BatchNorm1d default
_MAX_ROW_TILE = 1024             # 1024 x 128 f32 = 512 KiB / buffer
_VMEM_LIMIT_BYTES = 48 * 1024 * 1024   # explicit; leaves headroom on v7x (64 MiB)


# ----------------------------- tiling helpers ------------------------------ #
def _pick_row_tile(n):
    if n <= _MAX_ROW_TILE:
        return n                                # single block == full dim (exempt)
    for t in (1024, 512, 256, 128, 64, 32, 16, 8):
        if n % t == 0:
            return t
    return n                                    # TODO(synk): pad instead


def _pick_batch_tile(b, s, d):
    per_elem = s * (4 * d) * 4                  # qkv in + out, f32 bytes
    cap = max(1, min(4, (2 << 20) // max(per_elem, 1)))
    for t in range(min(b, cap), 0, -1):
        if b % t == 0:
            return t
    return 1


def _cparams(semantics):
    return pltpu.CompilerParams(
        dimension_semantics=semantics, vmem_limit_bytes=_VMEM_LIMIT_BYTES)


# ------------------------------- kernels ----------------------------------- #
def _linear_kernel(x_ref, w_ref, b_ref, o_ref, *, relu):
    # x:(TM,Din)  w:(Din,Dout)  b:(1,Dout)  o:(TM,Dout)
    y = jnp.dot(x_ref[...].astype(jnp.float32), w_ref[...],
                preferred_element_type=jnp.float32) + b_ref[...]
    if relu:
        y = jnp.maximum(y, 0.0)
    o_ref[...] = y.astype(o_ref.dtype)


def _linear_residual_kernel(x_ref, w_ref, b_ref, r_ref, o_ref):
    # y = x @ w + b + residual
    y = jnp.dot(x_ref[...].astype(jnp.float32), w_ref[...],
                preferred_element_type=jnp.float32)
    y = y + b_ref[...] + r_ref[...].astype(jnp.float32)
    o_ref[...] = y.astype(o_ref.dtype)


def _attention_kernel(qkv_ref, o_ref, *, n_heads, head_dim, n_batch):
    # qkv:(TB,S,3D) -> o:(TB,S,D); per-element, per-head softmax attention.
    d = n_heads * head_dim
    scale = 1.0 / math.sqrt(head_dim)
    for bi in range(n_batch):                      # static unroll (TB small)
        qkv = qkv_ref[bi].astype(jnp.float32)      # (S, 3D)
        heads = []
        for h in range(n_heads):                   # static unroll
            lo = h * head_dim
            qh = qkv[:, lo:lo + head_dim]
            kh = qkv[:, d + lo:d + lo + head_dim]
            vh = qkv[:, 2 * d + lo:2 * d + lo + head_dim]
            logits = jnp.dot(qh, kh.T, preferred_element_type=jnp.float32) * scale
            logits = logits - jnp.max(logits, axis=-1, keepdims=True)
            p = jnp.exp(logits)
            p = p / jnp.sum(p, axis=-1, keepdims=True)
            heads.append(jnp.dot(p, vh, preferred_element_type=jnp.float32))
        o_ref[bi] = jnp.concatenate(heads, axis=-1).astype(o_ref.dtype)


def _bn_stats_kernel(x_ref, stats_ref, *, n_rows):
    # Pass 1: accumulate per-feature sum / sum-of-squares in the resident
    # (2, D) output; convert to (mean, inv_std) on the last step.
    i = pl.program_id(0)

    @pl.when(i == 0)
    def _():
        stats_ref[...] = jnp.zeros_like(stats_ref)

    x = x_ref[...].astype(jnp.float32)             # (TM, D)
    stats_ref[0:1, :] += jnp.sum(x, axis=0, keepdims=True)
    stats_ref[1:2, :] += jnp.sum(x * x, axis=0, keepdims=True)

    @pl.when(i == pl.num_programs(0) - 1)
    def _():
        # f32 accumulation; E[x^2]-E[x]^2 is fine for moderate N / centered data.
        n = jnp.float32(n_rows)
        s = stats_ref[0:1, :]
        ss = stats_ref[1:2, :]
        mean = s / n
        var = jnp.maximum(ss / n - mean * mean, 0.0)   # biased var (training BN)
        stats_ref[0:1, :] = mean
        stats_ref[1:2, :] = jax.lax.rsqrt(var + EPS)


def _bn_apply_kernel(x_ref, stats_ref, w_ref, b_ref, o_ref):
    # Pass 2: streamed (x - mean) * inv_std * gamma + beta
    x = x_ref[...].astype(jnp.float32)
    mean = stats_ref[0:1, :]
    inv = stats_ref[1:2, :]
    o_ref[...] = ((x - mean) * inv * w_ref[...] + b_ref[...]).astype(o_ref.dtype)


# ------------------------------- wrappers ----------------------------------- #
def _linear(x2, w, b=None, residual=None, relu=False):
    n, din = x2.shape
    dout = w.shape[1]
    if b is None:
        b = jnp.zeros((dout,), jnp.float32)
    b2 = b.reshape(1, dout).astype(jnp.float32)
    w = w.astype(jnp.float32)

    tm = _pick_row_tile(n)
    grid = (n // tm,)
    x_spec = pl.BlockSpec((tm, din), lambda i: (i, 0))
    w_spec = pl.BlockSpec((din, dout), lambda i: (0, 0))   # constant -> 1 DMA
    b_spec = pl.BlockSpec((1, dout), lambda i: (0, 0))
    o_spec = pl.BlockSpec((tm, dout), lambda i: (i, 0))
    out_shape = jax.ShapeDtypeStruct((n, dout), x2.dtype)
    cp = _cparams(("parallel",))

    if residual is None:
        return pl.pallas_call(
            functools.partial(_linear_kernel, relu=relu),
            out_shape=out_shape,
            grid_spec=pltpu.PrefetchScalarGridSpec(
                num_scalar_prefetch=0, grid=grid,
                in_specs=[x_spec, w_spec, b_spec], out_specs=o_spec),
            compiler_params=cp,
        )(x2, w, b2)
    r_spec = pl.BlockSpec((tm, dout), lambda i: (i, 0))
    return pl.pallas_call(
        _linear_residual_kernel,
        out_shape=out_shape,
        grid_spec=pltpu.PrefetchScalarGridSpec(
            num_scalar_prefetch=0, grid=grid,
            in_specs=[x_spec, w_spec, b_spec, r_spec], out_specs=o_spec),
        compiler_params=cp,
    )(x2, w, b2, residual)


def _attention(qkv3, n_heads):
    b, s, three_d = qkv3.shape
    d = three_d // 3
    head_dim = d // n_heads
    tb = _pick_batch_tile(b, s, d)
    grid = (b // tb,)
    return pl.pallas_call(
        functools.partial(_attention_kernel, n_heads=n_heads,
                          head_dim=head_dim, n_batch=tb),
        out_shape=jax.ShapeDtypeStruct((b, s, d), qkv3.dtype),
        grid_spec=pltpu.PrefetchScalarGridSpec(
            num_scalar_prefetch=0, grid=grid,
            in_specs=[pl.BlockSpec((tb, s, three_d), lambda i: (i, 0, 0))],
            out_specs=pl.BlockSpec((tb, s, d), lambda i: (i, 0, 0))),
        compiler_params=_cparams(("parallel",)),
    )(qkv3)


def _batchnorm(x2, weight, bias):
    n, d = x2.shape
    tm = _pick_row_tile(n)
    grid = (n // tm,)
    x_spec = pl.BlockSpec((tm, d), lambda i: (i, 0))

    # Pass 1: per-feature stats (resident (2, D) accumulator output).
    stats = pl.pallas_call(
        functools.partial(_bn_stats_kernel, n_rows=float(n)),
        out_shape=jax.ShapeDtypeStruct((2, d), jnp.float32),
        grid_spec=pltpu.PrefetchScalarGridSpec(
            num_scalar_prefetch=0, grid=grid,
            in_specs=[x_spec],
            out_specs=pl.BlockSpec((2, d), lambda i: (0, 0))),
        compiler_params=_cparams(("arbitrary",)),
    )(x2)

    # Pass 2: streamed normalize + affine.
    w2 = weight.reshape(1, d).astype(jnp.float32)
    b2 = bias.reshape(1, d).astype(jnp.float32)
    return pl.pallas_call(
        _bn_apply_kernel,
        out_shape=jax.ShapeDtypeStruct((n, d), x2.dtype),
        grid_spec=pltpu.PrefetchScalarGridSpec(
            num_scalar_prefetch=0, grid=grid,
            in_specs=[x_spec,
                      pl.BlockSpec((2, d), lambda i: (0, 0)),
                      pl.BlockSpec((1, d), lambda i: (0, 0)),
                      pl.BlockSpec((1, d), lambda i: (0, 0))],
            out_specs=pl.BlockSpec((tm, d), lambda i: (i, 0))),
        compiler_params=_cparams(("parallel",)),
    )(x2, stats, w2, b2)


@functools.partial(jax.jit, static_argnames=("n_heads",))
def encoder_layer_forward(x, params, n_heads=4):
    """x: (B, n_nodes, embed_dim) -> (B, n_nodes, embed_dim)."""
    b, s, d = x.shape
    n = b * s
    x2 = x.reshape(n, d)

    # --- MHA sublayer: BN1(x + Wo @ attention(Wq x, Wk x, Wv x)) ------------ #
    w_qkv = jnp.concatenate([params["Wq"], params["Wk"], params["Wv"]], axis=1)
    qkv = _linear(x2, w_qkv)                                   # (N, 3D), no bias
    attn = _attention(qkv.reshape(b, s, 3 * d), n_heads)       # (B, S, D)
    h1_pre = _linear(attn.reshape(n, d), params["Wo"], residual=x2)
    h1 = _batchnorm(h1_pre, params["bn1_w"], params["bn1_b"])

    # --- FF sublayer: BN2(h1 + W2 relu(W1 h1 + b1) + b2) -------------------- #
    a = _linear(h1, params["W1"], b=params["b1"], relu=True)   # (N, H)
    h2_pre = _linear(a, params["W2"], b=params["b2"], residual=h1)
    h2 = _batchnorm(h2_pre, params["bn2_w"], params["bn2_b"])
    return h2.reshape(b, s, d)


# ------------------------------- reference ---------------------------------- #
def _ref_bn(x2, w, b):
    mean = x2.mean(0, keepdims=True)
    var = ((x2 - mean) ** 2).mean(0, keepdims=True)
    return (x2 - mean) / jnp.sqrt(var + EPS) * w + b


def _ref_encoder_layer(x, p, n_heads):
    b, s, d = x.shape
    hd = d // n_heads
    x2 = x.reshape(-1, d).astype(jnp.float32)
    q, k, v = x2 @ p["Wq"], x2 @ p["Wk"], x2 @ p["Wv"]

    def split(t):
        return t.reshape(b, s, n_heads, hd).transpose(0, 2, 1, 3)

    qh, kh, vh = split(q), split(k), split(v)
    logits = jnp.einsum("bhqd,bhkd->bhqk", qh, kh) / math.sqrt(hd)
    probs = jax.nn.softmax(logits, axis=-1)
    out = jnp.einsum("bhqk,bhkd->bhqd", probs, vh)
    out = out.transpose(0, 2, 1, 3).reshape(b * s, d)

    h1 = _ref_bn(x2 + out @ p["Wo"], p["bn1_w"], p["bn1_b"])
    a = jnp.maximum(h1 @ p["W1"] + p["b1"], 0.0)
    h2 = _ref_bn(h1 + a @ p["W2"] + p["b2"], p["bn2_w"], p["bn2_b"])
    return h2.reshape(b, s, d).astype(x.dtype)


# --------------------------------- main -------------------------------------- #
if __name__ == "__main__":
    B, S = 2, 8                 # (batch, n_nodes)
    D, H = 128, 128             # embed_dim, FF_hidden (module defaults)
    N_HEADS = 4                 # head_dim = 32 (module default n_heads=3 does not
                                # divide embed_dim=128; reference MHA would reject it)

    key = jax.random.PRNGKey(0)
    ks = jax.random.split(key, 14)

    def xavier(k, shape):
        lim = math.sqrt(6.0 / (shape[0] + shape[1]))
        return jax.random.uniform(k, shape, jnp.float32, -lim, lim)

    params = {
        "Wq": xavier(ks[0], (D, D)),
        "Wk": xavier(ks[1], (D, D)),
        "Wv": xavier(ks[2], (D, D)),
        "Wo": xavier(ks[3], (D, D)),
        "W1": xavier(ks[4], (D, H)),
        "b1": 0.01 * jax.random.normal(ks[5], (H,), jnp.float32),
        "W2": xavier(ks[6], (H, D)),
        "b2": 0.01 * jax.random.normal(ks[7], (D,), jnp.float32),
        "bn1_w": 1.0 + 0.1 * jax.random.normal(ks[8], (D,), jnp.float32),
        "bn1_b": 0.1 * jax.random.normal(ks[9], (D,), jnp.float32),
        "bn2_w": 1.0 + 0.1 * jax.random.normal(ks[10], (D,), jnp.float32),
        "bn2_b": 0.1 * jax.random.normal(ks[11], (D,), jnp.float32),
    }
    x = jax.random.normal(ks[12], (B, S, D), dtype=jnp.float32)

    out = encoder_layer_forward(x, params, n_heads=N_HEADS)
    jax.block_until_ready(out)

    with jax.default_matmul_precision("highest"):
        ref = _ref_encoder_layer(x, params, N_HEADS)

    assert out.shape == x.shape and out.dtype == x.dtype
    assert jnp.allclose(out, ref, atol=1e-3, rtol=1e-3), (
        float(jnp.max(jnp.abs(out - ref))))

    print("KERNEL_OK")
</pallas_src>

<mosaic_0001>
module attributes {stable_mosaic.version = 11 : i64} {
  func.func @_linear_kernel(%arg0: i32, %arg1: memref<16x128xf32, #tpu.memory_space<vmem>>, %arg2: memref<128x384xf32, #tpu.memory_space<vmem>>, %arg3: memref<1x384xf32, #tpu.memory_space<vmem>>, %arg4: memref<16x384xf32, #tpu.memory_space<vmem>>) attributes {dimension_semantics = [#tpu.dimension_semantics<parallel>], iteration_bounds = array<i64: 1>, scalar_prefetch = 0 : i64, scratch_operands = 0 : i64, tpu.core_type = #tpu.core_type<tc>, window_params = [{transform_indices = @transform_0, window_bounds = array<i64: 16, 128>}, {pipeline_mode = #tpu.pipeline_mode<synchronous>, transform_indices = @transform_1, window_bounds = array<i64: 128, 384>}, {pipeline_mode = #tpu.pipeline_mode<synchronous>, transform_indices = @transform_2, window_bounds = array<i64: 1, 384>}, {transform_indices = @transform_3, window_bounds = array<i64: 16, 384>}]} {
    %c0 = arith.constant 0 : index
    %c0_0 = arith.constant 0 : index
    %0 = vector.load %arg1[%c0, %c0_0] : memref<16x128xf32, #tpu.memory_space<vmem>>, vector<16x128xf32>
    %c0_1 = arith.constant 0 : index
    %c0_2 = arith.constant 0 : index
    %1 = vector.load %arg2[%c0_1, %c0_2] : memref<128x384xf32, #tpu.memory_space<vmem>>, vector<128x384xf32>
    %cst = arith.constant dense<0.000000e+00> : vector<16x384xf32>
    %2 = tpu.matmul %0, %1, %cst {dimension_numbers = #tpu.dot_dimension_numbers<[1], [0], [0], [1], [0, 0, 1, 1], [], []>} : vector<16x128xf32>, vector<128x384xf32>, vector<16x384xf32> -> vector<16x384xf32>
    %c0_3 = arith.constant 0 : index
    %c0_4 = arith.constant 0 : index
    %3 = vector.load %arg3[%c0_3, %c0_4] : memref<1x384xf32, #tpu.memory_space<vmem>>, vector<1x384xf32>
    %4 = vector.broadcast %3 : vector<1x384xf32> to vector<16x384xf32>
    %5 = arith.addf %2, %4 : vector<16x384xf32>
    %c0_5 = arith.constant 0 : index
    %c0_6 = arith.constant 0 : index
    %6 = vector.load %arg4[%c0_5, %c0_6] : memref<16x384xf32, #tpu.memory_space<vmem>>, vector<16x384xf32>
    tpu.vector_store %arg4[%c0_5, %c0_6], %5 {strides = array<i32>} : memref<16x384xf32, #tpu.memory_space<vmem>>, vector<16x384xf32>,
    return
  }
  func.func @transform_0(%arg0: i32) -> (i32, i32) {
    %c0_i32 = arith.constant 0 : i32
    %c0_i32_0 = arith.constant 0 : i32
    return %arg0, %c0_i32 : i32, i32
  }
  func.func @transform_1(%arg0: i32) -> (i32, i32) {
    %c0_i32 = arith.constant 0 : i32
    %c0_i32_0 = arith.constant 0 : i32
    %c0_i32_1 = arith.constant 0 : i32
    return %c0_i32, %c0_i32_0 : i32, i32
  }
  func.func @transform_2(%arg0: i32) -> (i32, i32) {
    %c0_i32 = arith.constant 0 : i32
    %c0_i32_0 = arith.constant 0 : i32
    %c0_i32_1 = arith.constant 0 : i32
    return %c0_i32, %c0_i32_0 : i32, i32
  }
  func.func @transform_3(%arg0: i32) -> (i32, i32) {
    %c0_i32 = arith.constant 0 : i32
    %c0_i32_0 = arith.constant 0 : i32
    return %arg0, %c0_i32 : i32, i32
  }
}

module attributes {stable_mosaic.version = 11 : i64} {
  func.func @_attention_kernel(%arg0: i32, %arg1: memref<2x8x384xf32, #tpu.memory_space<vmem>>, %arg2: memref<2x8x128xf32, #tpu.memory_space<vmem>>) attributes {dimension_semantics = [#tpu.dimension_semantics<parallel>], iteration_bounds = array<i64: 1>, scalar_prefetch = 0 : i64, scratch_operands = 0 : i64, tpu.core_type = #tpu.core_type<tc>, window_params = [{transform_indices = @transform_0, window_bounds = array<i64: 2, 8, 384>}, {transform_indices = @transform_1, window_bounds = array<i64: 2, 8, 128>}]} {
    %c0 = arith.constant 0 : index
    %c0_0 = arith.constant 0 : index
    %c0_1 = arith.constant 0 : index
    %0 = vector.load %arg1[%c0, %c0_0, %c0_1] : memref<2x8x384xf32, #tpu.memory_space<vmem>>, vector<1x8x384xf32>
    %1 = vector.shape_cast %0 : vector<1x8x384xf32> to vector<8x384xf32>
    %2 = vector.extract_strided_slice %1 {offsets = [0, 0], sizes = [8, 32], strides = [1, 1]} : vector<8x384xf32> to vector<8x32xf32>
    %3 = vector.extract_strided_slice %1 {offsets = [0, 128], sizes = [8, 32], strides = [1, 1]} : vector<8x384xf32> to vector<8x32xf32>
    %4 = vector.extract_strided_slice %1 {offsets = [0, 256], sizes = [8, 32], strides = [1, 1]} : vector<8x384xf32> to vector<8x32xf32>
    %5 = tpu.transpose %3, [1, 0] : vector<8x32xf32> -> vector<32x8xf32>
    %cst = arith.constant dense<0.000000e+00> : vector<8x8xf32>
    %6 = tpu.matmul %2, %5, %cst {dimension_numbers = #tpu.dot_dimension_numbers<[1], [0], [0], [1], [0, 0, 1, 1], [], []>} : vector<8x32xf32>, vector<32x8xf32>, vector<8x8xf32> -> vector<8x8xf32>
    %cst_2 = arith.constant 0.176776692 : f32
    %7 = vector.broadcast %cst_2 : f32 to vector<8x8xf32>
    %8 = arith.mulf %6, %7 : vector<8x8xf32>
    %cst_3 = arith.constant dense<0xFF800000> : vector<8xf32>
    %9 = vector.multi_reduction <maximumf>, %8, %cst_3 [1] : vector<8x8xf32> to vector<8xf32>
    %10 = vector.shape_cast %9 : vector<8xf32> to vector<8x1xf32>
    %11 = vector.broadcast %10 : vector<8x1xf32> to vector<8x8xf32>
    %12 = arith.subf %8, %11 : vector<8x8xf32>
    %13 = math.exp %12 : vector<8x8xf32>
    %cst_4 = arith.constant dense<0.000000e+00> : vector<8xf32>
    %14 = vector.multi_reduction <add>, %13, %cst_4 [1] : vector<8x8xf32> to vector<8xf32>
    %15 = vector.shape_cast %14 : vector<8xf32> to vector<8x1xf32>
    %16 = vector.broadcast %15 : vector<8x1xf32> to vector<8x8xf32>
    %17 = arith.divf %13, %16 : vector<8x8xf32>
    %cst_5 = arith.constant dense<0.000000e+00> : vector<8x32xf32>
    %18 = tpu.matmul %17, %4, %cst_5 {dimension_numbers = #tpu.dot_dimension_numbers<[1], [0], [0], [1], [0, 0, 1, 1], [], []>} : vector<8x8xf32>, vector<8x32xf32>, vector<8x32xf32> -> vector<8x32xf32>
    %19 = vector.extract_strided_slice %1 {offsets = [0, 32], sizes = [8, 32], strides = [1, 1]} : vector<8x384xf32> to vector<8x32xf32>
    %20 = vector.extract_strided_slice %1 {offsets = [0, 160], sizes = [8, 32], strides = [1, 1]} : vector<8x384xf32> to vector<8x32xf32>
    %21 = vector.extract_strided_slice %1 {offsets = [0, 288], sizes = [8, 32], strides = [1, 1]} : vector<8x384xf32> to vector<8x32xf32>
    %22 = tpu.transpose %20, [1, 0] : vector<8x32xf32> -> vector<32x8xf32>
    %cst_6 = arith.constant dense<0.000000e+00> : vector<8x8xf32>
    %23 = tpu.matmul %19, %22, %cst_6 {dimension_numbers = #tpu.dot_dimension_numbers<[1], [0], [0], [1], [0, 0, 1, 1], [], []>} : vector<8x32xf32>, vector<32x8xf32>, vector<8x8xf32> -> vector<8x8xf32>
    %cst_7 = arith.constant 0.176776692 : f32
    %24 = vector.broadcast %cst_7 : f32 to vector<8x8xf32>
    %25 = arith.mulf %23, %24 : vector<8x8xf32>
    %cst_8 = arith.constant dense<0xFF800000> : vector<8xf32>
    %26 = vector.multi_reduction <maximumf>, %25, %cst_8 [1] : vector<8x8xf32> to vector<8xf32>
    %27 = vector.shape_cast %26 : vector<8xf32> to vector<8x1xf32>
    %28 = vector.broadcast %27 : vector<8x1xf32> to vector<8x8xf32>
    %29 = arith.subf %25, %28 : vector<8x8xf32>
    %30 = math.exp %29 : vector<8x8xf32>
    %cst_9 = arith.constant dense<0.000000e+00> : vector<8xf32>
    %31 = vector.multi_reduction <add>, %30, %cst_9 [1] : vector<8x8xf32> to vector<8xf32>
    %32 = vector.shape_cast %31 : vector<8xf32> to vector<8x1xf32>
    %33 = vector.broadcast %32 : vector<8x1xf32> to vector<8x8xf32>
    %34 = arith.divf %30, %33 : vector<8x8xf32>
    %cst_10 = arith.constant dense<0.000000e+00> : vector<8x32xf32>
    %35 = tpu.matmul %34, %21, %cst_10 {dimension_numbers = #tpu.dot_dimension_numbers<[1], [0], [0], [1], [0, 0, 1, 1], [], []>} : vector<8x8xf32>, vector<8x32xf32>, vector<8x32xf32> -> vector<8x32xf32>
    %36 = vector.extract_strided_slice %1 {offsets = [0, 64], sizes = [8, 32], strides = [1, 1]} : vector<8x384xf32> to vector<8x32xf32>
    %37 = vector.extract_strided_slice %1 {offsets = [0, 192], sizes = [8, 32], strides = [1, 1]} : vector<8x384xf32> to vector<8x32xf32>
    %38 = vector.extract_strided_slice %1 {offsets = [0, 320], sizes = [8, 32], strides = [1, 1]} : vector<8x384xf32> to vector<8x32xf32>
    %39 = tpu.transpose %37, [1, 0] : vector<8x32xf32> -> vector<32x8xf32>
    %cst_11 = arith.constant dense<0.000000e+00> : vector<8x8xf32>
    %40 = tpu.matmul %36, %39, %cst_11 {dimension_numbers = #tpu.dot_dimension_numbers<[1], [0], [0], [1], [0, 0, 1, 1], [], []>} : vector<8x32xf32>, vector<32x8xf32>, vector<8x8xf32> -> vector<8x8xf32>
    %cst_12 = arith.constant 0.176776692 : f32
    %41 = vector.broadcast %cst_12 : f32 to vector<8x8xf32>
    %42 = arith.mulf %40, %41 : vector<8x8xf32>
    %cst_13 = arith.constant dense<0xFF800000> : vector<8xf32>
    %43 = vector.multi_reduction <maximumf>, %42, %cst_13 [1] : vector<8x8xf32> to vector<8xf32>
    %44 = vector.shape_cast %43 : vector<8xf32> to vector<8x1xf32>
    %45 = vector.broadcast %44 : vector<8x1xf32> to vector<8x8xf32>
    %46 = arith.subf %42, %45 : vector<8x8xf32>
    %47 = math.exp %46 : vector<8x8xf32>
    %cst_14 = arith.constant dense<0.000000e+00> : vector<8xf32>
    %48 = vector.multi_reduction <add>, %47, %cst_14 [1] : vector<8x8xf32> to vector<8xf32>
    %49 = vector.shape_cast %48 : vector<8xf32> to vector<8x1xf32>
    %50 = vector.broadcast %49 : vector<8x1xf32> to vector<8x8xf32>
    %51 = arith.divf %47, %50 : vector<8x8xf32>
    %cst_15 = arith.constant dense<0.000000e+00> : vector<8x32xf32>
    %52 = tpu.matmul %51, %38, %cst_15 {dimension_numbers = #tpu.dot_dimension_numbers<[1], [0], [0], [1], [0, 0, 1, 1], [], []>} : vector<8x8xf32>, vector<8x32xf32>, vector<8x32xf32> -> vector<8x32xf32>
    %53 = vector.extract_strided_slice %1 {offsets = [0, 96], sizes = [8, 32], strides = [1, 1]} : vector<8x384xf32> to vector<8x32xf32>
    %54 = vector.extract_strided_slice %1 {offsets = [0, 224], sizes = [8, 32], strides = [1, 1]} : vector<8x384xf32> to vector<8x32xf32>
    %55 = vector.extract_strided_slice %1 {offsets = [0, 352], sizes = [8, 32], strides = [1, 1]} : vector<8x384xf32> to vector<8x32xf32>
    %56 = tpu.transpose %54, [1, 0] : vector<8x32xf32> -> vector<32x8xf32>
    %cst_16 = arith.constant dense<0.000000e+00> : vector<8x8xf32>
    %57 = tpu.matmul %53, %56, %cst_16 {dimension_numbers = #tpu.dot_dimension_numbers<[1], [0], [0], [1], [0, 0, 1, 1], [], []>} : vector<8x32xf32>, vector<32x8xf32>, vector<8x8xf32> -> vector<8x8xf32>
    %cst_17 = arith.constant 0.176776692 : f32
    %58 = vector.broadcast %cst_17 : f32 to vector<8x8xf32>
    %59 = arith.mulf %57, %58 : vector<8x8xf32>
    %cst_18 = arith.constant dense<0xFF800000> : vector<8xf32>
    %60 = vector.multi_reduction <maximumf>, %59, %cst_18 [1] : vector<8x8xf32> to vector<8xf32>
    %61 = vector.shape_cast %60 : vector<8xf32> to vector<8x1xf32>
    %62 = vector.broadcast %61 : vector<8x1xf32> to vector<8x8xf32>
    %63 = arith.subf %59, %62 : vector<8x8xf32>
    %64 = math.exp %63 : vector<8x8xf32>
    %cst_19 = arith.constant dense<0.000000e+00> : vector<8xf32>
    %65 = vector.multi_reduction <add>, %64, %cst_19 [1] : vector<8x8xf32> to vector<8xf32>
    %66 = vector.shape_cast %65 : vector<8xf32> to vector<8x1xf32>
    %67 = vector.broadcast %66 : vector<8x1xf32> to vector<8x8xf32>
    %68 = arith.divf %64, %67 : vector<8x8xf32>
    %cst_20 = arith.constant dense<0.000000e+00> : vector<8x32xf32>
    %69 = tpu.matmul %68, %55, %cst_20 {dimension_numbers = #tpu.dot_dimension_numbers<[1], [0], [0], [1], [0, 0, 1, 1], [], []>} : vector<8x8xf32>, vector<8x32xf32>, vector<8x32xf32> -> vector<8x32xf32>
    %70 = tpu.concatenate %18, %35, %52, %69 in 1 : vector<8x32xf32>, vector<8x32xf32>, vector<8x32xf32>, vector<8x32xf32> -> vector<8x128xf32>
    %c0_21 = arith.constant 0 : index
    %c0_22 = arith.constant 0 : index
    %c0_23 = arith.constant 0 : index
    %71 = vector.load %arg2[%c0_21, %c0_22, %c0_23] : memref<2x8x128xf32, #tpu.memory_space<vmem>>, vector<1x8x128xf32>
    %72 = vector.shape_cast %71 : vector<1x8x128xf32> to vector<8x128xf32>
    %73 = vector.shape_cast %70 : vector<8x128xf32> to vector<1x8x128xf32>
    tpu.vector_store %arg2[%c0_21, %c0_22, %c0_23], %73 {strides = array<i32>} : memref<2x8x128xf32, #tpu.memory_space<vmem>>, vector<1x8x128xf32>,
    %c1 = arith.constant 1 : index
    %c0_24 = arith.constant 0 : index
    %c0_25 = arith.constant 0 : index
    %74 = vector.load %arg1[%c1, %c0_24, %c0_25] : memref<2x8x384xf32, #tpu.memory_space<vmem>>, vector<1x8x384xf32>
    %75 = vector.shape_cast %74 : vector<1x8x384xf32> to vector<8x384xf32>
    %76 = vector.extract_strided_slice %75 {offsets = [0, 0], sizes = [8, 32], strides = [1, 1]} : vector<8x384xf32> to vector<8x32xf32>
    %77 = vector.extract_strided_slice %75 {offsets = [0, 128], sizes = [8, 32], strides = [1, 1]} : vector<8x384xf32> to vector<8x32xf32>
    %78 = vector.extract_strided_slice %75 {offsets = [0, 256], sizes = [8, 32], strides = [1, 1]} : vector<8x384xf32> to vector<8x32xf32>
    %79 = tpu.transpose %77, [1, 0] : vector<8x32xf32> -> vector<32x8xf32>
    %cst_26 = arith.constant dense<0.000000e+00> : vector<8x8xf32>
    %80 = tpu.matmul %76, %79, %cst_26 {dimension_numbers = #tpu.dot_dimension_numbers<[1], [0], [0], [1], [0, 0, 1, 1], [], []>} : vector<8x32xf32>, vector<32x8xf32>, vector<8x8xf32> -> vector<8x8xf32>
    %cst_27 = arith.constant 0.176776692 : f32
    %81 = vector.broadcast %cst_27 : f32 to vector<8x8xf32>
    %82 = arith.mulf %80, %81 : vector<8x8xf32>
    %cst_28 = arith.constant dense<0xFF800000> : vector<8xf32>
    %83 = vector.multi_reduction <maximumf>, %82, %cst_28 [1] : vector<8x8xf32> to vector<8xf32>
    %84 = vector.shape_cast %83 : vector<8xf32> to vector<8x1xf32>
    %85 = vector.broadcast %84 : vector<8x1xf32> to vector<8x8xf32>
    %86 = arith.subf %82, %85 : vector<8x8xf32>
    %87 = math.exp %86 : vector<8x8xf32>
    %cst_29 = arith.constant dense<0.000000e+00> : vector<8xf32>
    %88 = vector.multi_reduction <add>, %87, %cst_29 [1] : vector<8x8xf32> to vector<8xf32>
    %89 = vector.shape_cast %88 : vector<8xf32> to vector<8x1xf32>
    %90 = vector.broadcast %89 : vector<8x1xf32> to vector<8x8xf32>
    %91 = arith.divf %87, %90 : vector<8x8xf32>
    %cst_30 = arith.constant dense<0.000000e+00> : vector<8x32xf32>
    %92 = tpu.matmul %91, %78, %cst_30 {dimension_numbers = #tpu.dot_dimension_numbers<[1], [0], [0], [1], [0, 0, 1, 1], [], []>} : vector<8x8xf32>, vector<8x32xf32>, vector<8x32xf32> -> vector<8x32xf32>
    %93 = vector.extract_strided_slice %75 {offsets = [0, 32], sizes = [8, 32], strides = [1, 1]} : vector<8x384xf32> to vector<8x32xf32>
    %94 = vector.extract_strided_slice %75 {offsets = [0, 160], sizes = [8, 32], strides = [1, 1]} : vector<8x384xf32> to vector<8x32xf32>
    %95 = vector.extract_strided_slice %75 {offsets = [0, 288], sizes = [8, 32], strides = [1, 1]} : vector<8x384xf32> to vector<8x32xf32>
    %96 = tpu.transpose %94, [1, 0] : vector<8x32xf32> -> vector<32x8xf32>
    %cst_31 = arith.constant dense<0.000000e+00> : vector<8x8xf32>
    %97 = tpu.matmul %93, %96, %cst_31 {dimension_numbers = #tpu.dot_dimension_numbers<[1], [0], [0], [1], [0, 0, 1, 1], [], []>} : vector<8x32xf32>, vector<32x8xf32>, vector<8x8xf32> -> vector<8x8xf32>
    %cst_32 = arith.constant 0.176776692 : f32
    %98 = vector.broadcast %cst_32 : f32 to vector<8x8xf32>
    %99 = arith.mulf %97, %98 : vector<8x8xf32>
    %cst_33 = arith.constant dense<0xFF800000> : vector<8xf32>
    %100 = vector.multi_reduction <maximumf>, %99, %cst_33 [1] : vector<8x8xf32> to vector<8xf32>
    %101 = vector.shape_cast %100 : vector<8xf32> to vector<8x1xf32>
    %102 = vector.broadcast %101 : vector<8x1xf32> to vector<8x8xf32>
    %103 = arith.subf %99, %102 : vector<8x8xf32>
    %104 = math.exp %103 : vector<8x8xf32>
    %cst_34 = arith.constant dense<0.000000e+00> : vector<8xf32>
    %105 = vector.multi_reduction <add>, %104, %cst_34 [1] : vector<8x8xf32> to vector<8xf32>
    %106 = vector.shape_cast %105 : vector<8xf32> to vector<8x1xf32>
    %107 = vector.broadcast %106 : vector<8x1xf32> to vector<8x8xf32>
    %108 = arith.divf %104, %107 : vector<8x8xf32>
    %cst_35 = arith.constant dense<0.000000e+00> : vector<8x32xf32>
    %109 = tpu.matmul %108, %95, %cst_35 {dimension_numbers = #tpu.dot_dimension_numbers<[1], [0], [0], [1], [0, 0, 1, 1], [], []>} : vector<8x8xf32>, vector<8x32xf32>, vector<8x32xf32> -> vector<8x32xf32>
    %110 = vector.extract_strided_slice %75 {offsets = [0, 64], sizes = [8, 32], strides = [1, 1]} : vector<8x384xf32> to vector<8x32xf32>
    %111 = vector.extract_strided_slice %75 {offsets = [0, 192], sizes = [8, 32], strides = [1, 1]} : vector<8x384xf32> to vector<8x32xf32>
    %112 = vector.extract_strided_slice %75 {offsets = [0, 320], sizes = [8, 32], strides = [1, 1]} : vector<8x384xf32> to vector<8x32xf32>
    %113 = tpu.transpose %111, [1, 0] : vector<8x32xf32> -> vector<32x8xf32>
    %cst_36 = arith.constant dense<0.000000e+00> : vector<8x8xf32>
    %114 = tpu.matmul %110, %113, %cst_36 {dimension_numbers = #tpu.dot_dimension_numbers<[1], [0], [0], [1], [0, 0, 1, 1], [], []>} : vector<8x32xf32>, vector<32x8xf32>, vector<8x8xf32> -> vector<8x8xf32>
    %cst_37 = arith.constant 0.176776692 : f32
    %115 = vector.broadcast %cst_37 : f32 to vector<8x8xf32>
    %116 = arith.mulf %114, %115 : vector<8x8xf32>
    %cst_38 = arith.constant dense<0xFF800000> : vector<8xf32>
    %117 = vector.multi_reduction <maximumf>, %116, %cst_38 [1] : vector<8x8xf32> to vector<8xf32>
    %118 = vector.shape_cast %117 : vector<8xf32> to vector<8x1xf32>
    %119 = vector.broadcast %118 : vector<8x1xf32> to vector<8x8xf32>
    %120 = arith.subf %116, %119 : vector<8x8xf32>
    %121 = math.exp %120 : vector<8x8xf32>
    %cst_39 = arith.constant dense<0.000000e+00> : vector<8xf32>
    %122 = vector.multi_reduction <add>, %121, %cst_39 [1] : vector<8x8xf32> to vector<8xf32>
    %123 = vector.shape_cast %122 : vector<8xf32> to vector<8x1xf32>
    %124 = vector.broadcast %123 : vector<8x1xf32> to vector<8x8xf32>
    %125 = arith.divf %121, %124 : vector<8x8xf32>
    %cst_40 = arith.constant dense<0.000000e+00> : vector<8x32xf32>
    %126 = tpu.matmul %125, %112, %cst_40 {dimension_numbers = #tpu.dot_dimension_numbers<[1], [0], [0], [1], [0, 0, 1, 1], [], []>} : vector<8x8xf32>, vector<8x32xf32>, vector<8x32xf32> -> vector<8x32xf32>
    %127 = vector.extract_strided_slice %75 {offsets = [0, 96], sizes = [8, 32], strides = [1, 1]} : vector<8x384xf32> to vector<8x32xf32>
    %128 = vector.extract_strided_slice %75 {offsets = [0, 224], sizes = [8, 32], strides = [1, 1]} : vector<8x384xf32> to vector<8x32xf32>
    %129 = vector.extract_strided_slice %75 {offsets = [0, 352], sizes = [8, 32], strides = [1, 1]} : vector<8x384xf32> to vector<8x32xf32>
    %130 = tpu.transpose %128, [1, 0] : vector<8x32xf32> -> vector<32x8xf32>
    %cst_41 = arith.constant dense<0.000000e+00> : vector<8x8xf32>
    %131 = tpu.matmul %127, %130, %cst_41 {dimension_numbers = #tpu.dot_dimension_numbers<[1], [0], [0], [1], [0, 0, 1, 1], [], []>} : vector<8x32xf32>, vector<32x8xf32>, vector<8x8xf32> -> vector<8x8xf32>
    %cst_42 = arith.constant 0.176776692 : f32
    %132 = vector.broadcast %cst_42 : f32 to vector<8x8xf32>
    %133 = arith.mulf %131, %132 : vector<8x8xf32>
    %cst_43 = arith.constant dense<0xFF800000> : vector<8xf32>
    %134 = vector.multi_reduction <maximumf>, %133, %cst_43 [1] : vector<8x8xf32> to vector<8xf32>
    %135 = vector.shape_cast %134 : vector<8xf32> to vector<8x1xf32>
    %136 = vector.broadcast %135 : vector<8x1xf32> to vector<8x8xf32>
    %137 = arith.subf %133, %136 : vector<8x8xf32>
    %138 = math.exp %137 : vector<8x8xf32>
    %cst_44 = arith.constant dense<0.000000e+00> : vector<8xf32>
    %139 = vector.multi_reduction <add>, %138, %cst_44 [1] : vector<8x8xf32> to vector<8xf32>
    %140 = vector.shape_cast %139 : vector<8xf32> to vector<8x1xf32>
    %141 = vector.broadcast %140 : vector<8x1xf32> to vector<8x8xf32>
    %142 = arith.divf %138, %141 : vector<8x8xf32>
    %cst_45 = arith.constant dense<0.000000e+00> : vector<8x32xf32>
    %143 = tpu.matmul %142, %129, %cst_45 {dimension_numbers = #tpu.dot_dimension_numbers<[1], [0], [0], [1], [0, 0, 1, 1], [], []>} : vector<8x8xf32>, vector<8x32xf32>, vector<8x32xf32> -> vector<8x32xf32>
    %144 = tpu.concatenate %92, %109, %126, %143 in 1 : vector<8x32xf32>, vector<8x32xf32>, vector<8x32xf32>, vector<8x32xf32> -> vector<8x128xf32>
    %c1_46 = arith.constant 1 : index
    %c0_47 = arith.constant 0 : index
    %c0_48 = arith.constant 0 : index
    %145 = vector.load %arg2[%c1_46, %c0_47, %c0_48] : memref<2x8x128xf32, #tpu.memory_space<vmem>>, vector<1x8x128xf32>
    %146 = vector.shape_cast %145 : vector<1x8x128xf32> to vector<8x128xf32>
    %147 = vector.shape_cast %144 : vector<8x128xf32> to vector<1x8x128xf32>
    tpu.vector_store %arg2[%c1_46, %c0_47, %c0_48], %147 {strides = array<i32>} : memref<2x8x128xf32, #tpu.memory_space<vmem>>, vector<1x8x128xf32>,
    return
  }
  func.func @transform_0(%arg0: i32) -> (i32, i32, i32) {
    %c0_i32 = arith.constant 0 : i32
    %c0_i32_0 = arith.constant 0 : i32
    %c0_i32_1 = arith.constant 0 : i32
    return %arg0, %c0_i32, %c0_i32_0 : i32, i32, i32
  }
  func.func @transform_1(%arg0: i32) -> (i32, i32, i32) {
    %c0_i32 = arith.constant 0 : i32
    %c0_i32_0 = arith.constant 0 : i32
    %c0_i32_1 = arith.constant 0 : i32
    return %arg0, %c0_i32, %c0_i32_0 : i32, i32, i32
  }
}

module attributes {stable_mosaic.version = 11 : i64} {
  func.func @_linear_residual_kernel(%arg0: i32, %arg1: memref<16x128xf32, #tpu.memory_space<vmem>>, %arg2: memref<128x128xf32, #tpu.memory_space<vmem>>, %arg3: memref<1x128xf32, #tpu.memory_space<vmem>>, %arg4: memref<16x128xf32, #tpu.memory_space<vmem>>, %arg5: memref<16x128xf32, #tpu.memory_space<vmem>>) attributes {dimension_semantics = [#tpu.dimension_semantics<parallel>], iteration_bounds = array<i64: 1>, scalar_prefetch = 0 : i64, scratch_operands = 0 : i64, tpu.core_type = #tpu.core_type<tc>, window_params = [{transform_indices = @transform_0, window_bounds = array<i64: 16, 128>}, {pipeline_mode = #tpu.pipeline_mode<synchronous>, transform_indices = @transform_1, window_bounds = array<i64: 128, 128>}, {pipeline_mode = #tpu.pipeline_mode<synchronous>, transform_indices = @transform_2, window_bounds = array<i64: 1, 128>}, {transform_indices = @transform_3, window_bounds = array<i64: 16, 128>}, {transform_indices = @transform_4, window_bounds = array<i64: 16, 128>}]} {
    %c0 = arith.constant 0 : index
    %c0_0 = arith.constant 0 : index
    %0 = vector.load %arg1[%c0, %c0_0] : memref<16x128xf32, #tpu.memory_space<vmem>>, vector<16x128xf32>
    %c0_1 = arith.constant 0 : index
    %c0_2 = arith.constant 0 : index
    %1 = vector.load %arg2[%c0_1, %c0_2] : memref<128x128xf32, #tpu.memory_space<vmem>>, vector<128x128xf32>
    %cst = arith.constant dense<0.000000e+00> : vector<16x128xf32>
    %2 = tpu.matmul %0, %1, %cst {dimension_numbers = #tpu.dot_dimension_numbers<[1], [0], [0], [1], [0, 0, 1, 1], [], []>} : vector<16x128xf32>, vector<128x128xf32>, vector<16x128xf32> -> vector<16x128xf32>
    %c0_3 = arith.constant 0 : index
    %c0_4 = arith.constant 0 : index
    %3 = vector.load %arg3[%c0_3, %c0_4] : memref<1x128xf32, #tpu.memory_space<vmem>>, vector<1x128xf32>
    %4 = vector.broadcast %3 : vector<1x128xf32> to vector<16x128xf32>
    %5 = arith.addf %2, %4 : vector<16x128xf32>
    %c0_5 = arith.constant 0 : index
    %c0_6 = arith.constant 0 : index
    %6 = vector.load %arg4[%c0_5, %c0_6] : memref<16x128xf32, #tpu.memory_space<vmem>>, vector<16x128xf32>
    %7 = arith.addf %5, %6 : vector<16x128xf32>
    %c0_7 = arith.constant 0 : index
    %c0_8 = arith.constant 0 : index
    %8 = vector.load %arg5[%c0_7, %c0_8] : memref<16x128xf32, #tpu.memory_space<vmem>>, vector<16x128xf32>
    tpu.vector_store %arg5[%c0_7, %c0_8], %7 {strides = array<i32>} : memref<16x128xf32, #tpu.memory_space<vmem>>, vector<16x128xf32>,
    return
  }
  func.func @transform_0(%arg0: i32) -> (i32, i32) {
    %c0_i32 = arith.constant 0 : i32
    %c0_i32_0 = arith.constant 0 : i32
    return %arg0, %c0_i32 : i32, i32
  }
  func.func @transform_1(%arg0: i32) -> (i32, i32) {
    %c0_i32 = arith.constant 0 : i32
    %c0_i32_0 = arith.constant 0 : i32
    %c0_i32_1 = arith.constant 0 : i32
    return %c0_i32, %c0_i32_0 : i32, i32
  }
  func.func @transform_2(%arg0: i32) -> (i32, i32) {
    %c0_i32 = arith.constant 0 : i32
    %c0_i32_0 = arith.constant 0 : i32
    %c0_i32_1 = arith.constant 0 : i32
    return %c0_i32, %c0_i32_0 : i32, i32
  }
  func.func @transform_3(%arg0: i32) -> (i32, i32) {
    %c0_i32 = arith.constant 0 : i32
    %c0_i32_0 = arith.constant 0 : i32
    return %arg0, %c0_i32 : i32, i32
  }
  func.func @transform_4(%arg0: i32) -> (i32, i32) {
    %c0_i32 = arith.constant 0 : i32
    %c0_i32_0 = arith.constant 0 : i32
    return %arg0, %c0_i32 : i32, i32
  }
}

module attributes {stable_mosaic.version = 11 : i64} {
  func.func @_bn_stats_kernel(%arg0: i32, %arg1: memref<16x128xf32, #tpu.memory_space<vmem>>, %arg2: memref<2x128xf32, #tpu.memory_space<vmem>>) attributes {dimension_semantics = [#tpu.dimension_semantics<arbitrary>], iteration_bounds = array<i64: 1>, scalar_prefetch = 0 : i64, scratch_operands = 0 : i64, tpu.core_type = #tpu.core_type<tc>, window_params = [{transform_indices = @transform_0, window_bounds = array<i64: 16, 128>}, {pipeline_mode = #tpu.pipeline_mode<synchronous>, transform_indices = @transform_1, window_bounds = array<i64: 2, 128>}]} {
    %c0_i32 = arith.constant 0 : i32
    %0 = arith.cmpi eq, %arg0, %c0_i32 : i32
    %1 = arith.extui %0 : i1 to i32
    %c0_i32_0 = arith.constant 0 : i32
    %2 = arith.cmpi ne, %1, %c0_i32_0 : i32
    scf.if %2 {
      %cst_12 = arith.constant 0.000000e+00 : f32
      %18 = vector.broadcast %cst_12 : f32 to vector<2x128xf32>
      %c0_13 = arith.constant 0 : index
      %c0_14 = arith.constant 0 : index
      %19 = vector.load %arg2[%c0_13, %c0_14] : memref<2x128xf32, #tpu.memory_space<vmem>>, vector<2x128xf32>
      tpu.vector_store %arg2[%c0_13, %c0_14], %18 {strides = array<i32>} : memref<2x128xf32, #tpu.memory_space<vmem>>, vector<2x128xf32>,
    } else {
    }
    %c0 = arith.constant 0 : index
    %c0_1 = arith.constant 0 : index
    %3 = vector.load %arg1[%c0, %c0_1] : memref<16x128xf32, #tpu.memory_space<vmem>>, vector<16x128xf32>
    %c0_2 = arith.constant 0 : index
    %c0_3 = arith.constant 0 : index
    %4 = vector.load %arg2[%c0_2, %c0_3] : memref<2x128xf32, #tpu.memory_space<vmem>>, vector<1x128xf32>
    %cst = arith.constant dense<0.000000e+00> : vector<128xf32>
    %5 = vector.multi_reduction <add>, %3, %cst [0] : vector<16x128xf32> to vector<128xf32>
    %6 = vector.shape_cast %5 : vector<128xf32> to vector<1x128xf32>
    %7 = arith.addf %4, %6 : vector<1x128xf32>
    %c0_4 = arith.constant 0 : index
    %c0_5 = arith.constant 0 : index
    %8 = vector.load %arg2[%c0_4, %c0_5] : memref<2x128xf32, #tpu.memory_space<vmem>>, vector<1x128xf32>
    tpu.vector_store %arg2[%c0_4, %c0_5], %7 {strides = array<i32>} : memref<2x128xf32, #tpu.memory_space<vmem>>, vector<1x128xf32>,
    %c1 = arith.constant 1 : index
    %c0_6 = arith.constant 0 : index
    %9 = vector.load %arg2[%c1, %c0_6] : memref<2x128xf32, #tpu.memory_space<vmem>>, vector<1x128xf32>
    %10 = arith.mulf %3, %3 : vector<16x128xf32>
    %cst_7 = arith.constant dense<0.000000e+00> : vector<128xf32>
    %11 = vector.multi_reduction <add>, %10, %cst_7 [0] : vector<16x128xf32> to vector<128xf32>
    %12 = vector.shape_cast %11 : vector<128xf32> to vector<1x128xf32>
    %13 = arith.addf %9, %12 : vector<1x128xf32>
    %c1_8 = arith.constant 1 : index
    %c0_9 = arith.constant 0 : index
    %14 = vector.load %arg2[%c1_8, %c0_9] : memref<2x128xf32, #tpu.memory_space<vmem>>, vector<1x128xf32>
    tpu.vector_store %arg2[%c1_8, %c0_9], %13 {strides = array<i32>} : memref<2x128xf32, #tpu.memory_space<vmem>>, vector<1x128xf32>,
    %c0_i32_10 = arith.constant 0 : i32
    %15 = arith.cmpi eq, %arg0, %c0_i32_10 : i32
    %16 = arith.extui %15 : i1 to i32
    %c0_i32_11 = arith.constant 0 : i32
    %17 = arith.cmpi ne, %16, %c0_i32_11 : i32
    scf.if %17 {
      %c0_12 = arith.constant 0 : index
      %c0_13 = arith.constant 0 : index
      %18 = vector.load %arg2[%c0_12, %c0_13] : memref<2x128xf32, #tpu.memory_space<vmem>>, vector<1x128xf32>
      %c1_14 = arith.constant 1 : index
      %c0_15 = arith.constant 0 : index
      %19 = vector.load %arg2[%c1_14, %c0_15] : memref<2x128xf32, #tpu.memory_space<vmem>>, vector<1x128xf32>
      %cst_16 = arith.constant 1.600000e+01 : f32
      %20 = vector.broadcast %cst_16 : f32 to vector<1x128xf32>
      %21 = arith.divf %18, %20 : vector<1x128xf32>
      %cst_17 = arith.constant 1.600000e+01 : f32
      %22 = vector.broadcast %cst_17 : f32 to vector<1x128xf32>
      %23 = arith.divf %19, %22 : vector<1x128xf32>
      %24 = arith.mulf %21, %21 : vector<1x128xf32>
      %25 = arith.subf %23, %24 : vector<1x128xf32>
      %cst_18 = arith.constant 0.000000e+00 : f32
      %26 = vector.broadcast %cst_18 : f32 to vector<1x128xf32>
      %27 = arith.maximumf %25, %26 : vector<1x128xf32>
      %c0_19 = arith.constant 0 : index
      %c0_20 = arith.constant 0 : index
      %28 = vector.load %arg2[%c0_19, %c0_20] : memref<2x128xf32, #tpu.memory_space<vmem>>, vector<1x128xf32>
      tpu.vector_store %arg2[%c0_19, %c0_20], %21 {strides = array<i32>} : memref<2x128xf32, #tpu.memory_space<vmem>>, vector<1x128xf32>,
      %cst_21 = arith.constant 9.99999974E-6 : f32
      %29 = vector.broadcast %cst_21 : f32 to vector<1x128xf32>
      %30 = arith.addf %27, %29 : vector<1x128xf32>
      %31 = math.rsqrt %30 : vector<1x128xf32>
      %c1_22 = arith.constant 1 : index
      %c0_23 = arith.constant 0 : index
      %32 = vector.load %arg2[%c1_22, %c0_23] : memref<2x128xf32, #tpu.memory_space<vmem>>, vector<1x128xf32>
      tpu.vector_store %arg2[%c1_22, %c0_23], %31 {strides = array<i32>} : memref<2x128xf32, #tpu.memory_space<vmem>>, vector<1x128xf32>,
    } else {
    }
    return
  }
  func.func @transform_0(%arg0: i32) -> (i32, i32) {
    %c0_i32 = arith.constant 0 : i32
    %c0_i32_0 = arith.constant 0 : i32
    return %arg0, %c0_i32 : i32, i32
  }
  func.func @transform_1(%arg0: i32) -> (i32, i32) {
    %c0_i32 = arith.constant 0 : i32
    %c0_i32_0 = arith.constant 0 : i32
    %c0_i32_1 = arith.constant 0 : i32
    return %c0_i32, %c0_i32_0 : i32, i32
  }
}

module attributes {stable_mosaic.version = 11 : i64} {
  func.func @_bn_apply_kernel(%arg0: i32, %arg1: memref<16x128xf32, #tpu.memory_space<vmem>>, %arg2: memref<2x128xf32, #tpu.memory_space<vmem>>, %arg3: memref<1x128xf32, #tpu.memory_space<vmem>>, %arg4: memref<1x128xf32, #tpu.memory_space<vmem>>, %arg5: memref<16x128xf32, #tpu.memory_space<vmem>>) attributes {dimension_semantics = [#tpu.dimension_semantics<parallel>], iteration_bounds = array<i64: 1>, scalar_prefetch = 0 : i64, scratch_operands = 0 : i64, tpu.core_type = #tpu.core_type<tc>, window_params = [{transform_indices = @transform_0, window_bounds = array<i64: 16, 128>}, {pipeline_mode = #tpu.pipeline_mode<synchronous>, transform_indices = @transform_1, window_bounds = array<i64: 2, 128>}, {pipeline_mode = #tpu.pipeline_mode<synchronous>, transform_indices = @transform_2, window_bounds = array<i64: 1, 128>}, {pipeline_mode = #tpu.pipeline_mode<synchronous>, transform_indices = @transform_3, window_bounds = array<i64: 1, 128>}, {transform_indices = @transform_4, window_bounds = array<i64: 16, 128>}]} {
    %c0 = arith.constant 0 : index
    %c0_0 = arith.constant 0 : index
    %0 = vector.load %arg1[%c0, %c0_0] : memref<16x128xf32, #tpu.memory_space<vmem>>, vector<16x128xf32>
    %c0_1 = arith.constant 0 : index
    %c0_2 = arith.constant 0 : index
    %1 = vector.load %arg2[%c0_1, %c0_2] : memref<2x128xf32, #tpu.memory_space<vmem>>, vector<1x128xf32>
    %c1 = arith.constant 1 : index
    %c0_3 = arith.constant 0 : index
    %2 = vector.load %arg2[%c1, %c0_3] : memref<2x128xf32, #tpu.memory_space<vmem>>, vector<1x128xf32>
    %3 = vector.broadcast %1 : vector<1x128xf32> to vector<16x128xf32>
    %4 = arith.subf %0, %3 : vector<16x128xf32>
    %5 = vector.broadcast %2 : vector<1x128xf32> to vector<16x128xf32>
    %6 = arith.mulf %4, %5 : vector<16x128xf32>
    %c0_4 = arith.constant 0 : index
    %c0_5 = arith.constant 0 : index
    %7 = vector.load %arg3[%c0_4, %c0_5] : memref<1x128xf32, #tpu.memory_space<vmem>>, vector<1x128xf32>
    %8 = vector.broadcast %7 : vector<1x128xf32> to vector<16x128xf32>
    %9 = arith.mulf %6, %8 : vector<16x128xf32>
    %c0_6 = arith.constant 0 : index
    %c0_7 = arith.constant 0 : index
    %10 = vector.load %arg4[%c0_6, %c0_7] : memref<1x128xf32, #tpu.memory_space<vmem>>, vector<1x128xf32>
    %11 = vector.broadcast %10 : vector<1x128xf32> to vector<16x128xf32>
    %12 = arith.addf %9, %11 : vector<16x128xf32>
    %c0_8 = arith.constant 0 : index
    %c0_9 = arith.constant 0 : index
    %13 = vector.load %arg5[%c0_8, %c0_9] : memref<16x128xf32, #tpu.memory_space<vmem>>, vector<16x128xf32>
    tpu.vector_store %arg5[%c0_8, %c0_9], %12 {strides = array<i32>} : memref<16x128xf32, #tpu.memory_space<vmem>>, vector<16x128xf32>,
    return
  }
  func.func @transform_0(%arg0: i32) -> (i32, i32) {
    %c0_i32 = arith.constant 0 : i32
    %c0_i32_0 = arith.constant 0 : i32
    return %arg0, %c0_i32 : i32, i32
  }
  func.func @transform_1(%arg0: i32) -> (i32, i32) {
    %c0_i32 = arith.constant 0 : i32
    %c0_i32_0 = arith.constant 0 : i32
    %c0_i32_1 = arith.constant 0 : i32
    return %c0_i32, %c0_i32_0 : i32, i32
  }
  func.func @transform_2(%arg0: i32) -> (i32, i32) {
    %c0_i32 = arith.constant 0 : i32
    %c0_i32_0 = arith.constant 0 : i32
    %c0_i32_1 = arith.constant 0 : i32
    return %c0_i32, %c0_i32_0 : i32, i32
  }
  func.func @transform_3(%arg0: i32) -> (i32, i32) {
    %c0_i32 = arith.constant 0 : i32
    %c0_i32_0 = arith.constant 0 : i32
    %c0_i32_1 = arith.constant 0 : i32
    return %c0_i32, %c0_i32_0 : i32, i32
  }
  func.func @transform_4(%arg0: i32) -> (i32, i32) {
    %c0_i32 = arith.constant 0 : i32
    %c0_i32_0 = arith.constant 0 : i32
    return %arg0, %c0_i32 : i32, i32
  }
}

module attributes {stable_mosaic.version = 11 : i64} {
  func.func @_bn_apply_kernel(%arg0: i32, %arg1: memref<16x128xf32, #tpu.memory_space<vmem>>, %arg2: memref<2x128xf32, #tpu.memory_space<vmem>>, %arg3: memref<1x128xf32, #tpu.memory_space<vmem>>, %arg4: memref<1x128xf32, #tpu.memory_space<vmem>>, %arg5: memref<16x128xf32, #tpu.memory_space<vmem>>) attributes {dimension_semantics = [#tpu.dimension_semantics<parallel>], iteration_bounds = array<i64: 1>, scalar_prefetch = 0 : i64, scratch_operands = 0 : i64, tpu.core_type = #tpu.core_type<tc>, window_params = [{transform_indices = @transform_0, window_bounds = array<i64: 16, 128>}, {pipeline_mode = #tpu.pipeline_mode<synchronous>, transform_indices = @transform_1, window_bounds = array<i64: 2, 128>}, {pipeline_mode = #tpu.pipeline_mode<synchronous>, transform_indices = @transform_2, window_bounds = array<i64: 1, 128>}, {pipeline_mode = #tpu.pipeline_mode<synchronous>, transform_indices = @transform_3, window_bounds = array<i64: 1, 128>}, {transform_indices = @transform_4, window_bounds = array<i64: 16, 128>}]} {
    %c0 = arith.constant 0 : index
    %c0_0 = arith.constant 0 : index
    %0 = vector.load %arg1[%c0, %c0_0] : memref<16x128xf32, #tpu.memory_space<vmem>>, vector<16x128xf32>
    %c0_1 = arith.constant 0 : index
    %c0_2 = arith.constant 0 : index
    %1 = vector.load %arg2[%c0_1, %c0_2] : memref<2x128xf32, #tpu.memory_space<vmem>>, vector<1x128xf32>
    %c1 = arith.constant 1 : index
    %c0_3 = arith.constant 0 : index
    %2 = vector.load %arg2[%c1, %c0_3] : memref<2x128xf32, #tpu.memory_space<vmem>>, vector<1x128xf32>
    %3 = vector.broadcast %1 : vector<1x128xf32> to vector<16x128xf32>
    %4 = arith.subf %0, %3 : vector<16x128xf32>
    %5 = vector.broadcast %2 : vector<1x128xf32> to vector<16x128xf32>
    %6 = arith.mulf %4, %5 : vector<16x128xf32>
    %c0_4 = arith.constant 0 : index
    %c0_5 = arith.constant 0 : index
    %7 = vector.load %arg3[%c0_4, %c0_5] : memref<1x128xf32, #tpu.memory_space<vmem>>, vector<1x128xf32>
    %8 = vector.broadcast %7 : vector<1x128xf32> to vector<16x128xf32>
    %9 = arith.mulf %6, %8 : vector<16x128xf32>
    %c0_6 = arith.constant 0 : index
    %c0_7 = arith.constant 0 : index
    %10 = vector.load %arg4[%c0_6, %c0_7] : memref<1x128xf32, #tpu.memory_space<vmem>>, vector<1x128xf32>
    %11 = vector.broadcast %10 : vector<1x128xf32> to vector<16x128xf32>
    %12 = arith.addf %9, %11 : vector<16x128xf32>
    %c0_8 = arith.constant 0 : index
    %c0_9 = arith.constant 0 : index
    %13 = vector.load %arg5[%c0_8, %c0_9] : memref<16x128xf32, #tpu.memory_space<vmem>>, vector<16x128xf32>
    tpu.vector_store %arg5[%c0_8, %c0_9], %12 {strides = array<i32>} : memref<16x128xf32, #tpu.memory_space<vmem>>, vector<16x128xf32>,
    return
  }
  func.func @transform_0(%arg0: i32) -> (i32, i32) {
    %c0_i32 = arith.constant 0 : i32
    %c0_i32_0 = arith.constant 0 : i32
    return %arg0, %c0_i32 : i32, i32
  }
  func.func @transform_1(%arg0: i32) -> (i32, i32) {
    %c0_i32 = arith.constant 0 : i32
    %c0_i32_0 = arith.constant 0 : i32
    %c0_i32_1 = arith.constant 0 : i32
    return %c0_i32, %c0_i32_0 : i32, i32
  }
  func.func @transform_2(%arg0: i32) -> (i32, i32) {
    %c0_i32 = arith.constant 0 : i32
    %c0_i32_0 = arith.constant 0 : i32
    %c0_i32_1 = arith.constant 0 : i32
    return %c0_i32, %c0_i32_0 : i32, i32
  }
  func.func @transform_3(%arg0: i32) -> (i32, i32) {
    %c0_i32 = arith.constant 0 : i32
    %c0_i32_0 = arith.constant 0 : i32
    %c0_i32_1 = arith.constant 0 : i32
    return %c0_i32, %c0_i32_0 : i32, i32
  }
  func.func @transform_4(%arg0: i32) -> (i32, i32) {
    %c0_i32 = arith.constant 0 : i32
    %c0_i32_0 = arith.constant 0 : i32
    return %arg0, %c0_i32 : i32, i32
  }
}

module attributes {stable_mosaic.version = 11 : i64} {
  func.func @_linear_kernel(%arg0: i32, %arg1: memref<16x128xf32, #tpu.memory_space<vmem>>, %arg2: memref<128x128xf32, #tpu.memory_space<vmem>>, %arg3: memref<1x128xf32, #tpu.memory_space<vmem>>, %arg4: memref<16x128xf32, #tpu.memory_space<vmem>>) attributes {dimension_semantics = [#tpu.dimension_semantics<parallel>], iteration_bounds = array<i64: 1>, scalar_prefetch = 0 : i64, scratch_operands = 0 : i64, tpu.core_type = #tpu.core_type<tc>, window_params = [{transform_indices = @transform_0, window_bounds = array<i64: 16, 128>}, {pipeline_mode = #tpu.pipeline_mode<synchronous>, transform_indices = @transform_1, window_bounds = array<i64: 128, 128>}, {pipeline_mode = #tpu.pipeline_mode<synchronous>, transform_indices = @transform_2, window_bounds = array<i64: 1, 128>}, {transform_indices = @transform_3, window_bounds = array<i64: 16, 128>}]} {
    %c0 = arith.constant 0 : index
    %c0_0 = arith.constant 0 : index
    %0 = vector.load %arg1[%c0, %c0_0] : memref<16x128xf32, #tpu.memory_space<vmem>>, vector<16x128xf32>
    %c0_1 = arith.constant 0 : index
    %c0_2 = arith.constant 0 : index
    %1 = vector.load %arg2[%c0_1, %c0_2] : memref<128x128xf32, #tpu.memory_space<vmem>>, vector<128x128xf32>
    %cst = arith.constant dense<0.000000e+00> : vector<16x128xf32>
    %2 = tpu.matmul %0, %1, %cst {dimension_numbers = #tpu.dot_dimension_numbers<[1], [0], [0], [1], [0, 0, 1, 1], [], []>} : vector<16x128xf32>, vector<128x128xf32>, vector<16x128xf32> -> vector<16x128xf32>
    %c0_3 = arith.constant 0 : index
    %c0_4 = arith.constant 0 : index
    %3 = vector.load %arg3[%c0_3, %c0_4] : memref<1x128xf32, #tpu.memory_space<vmem>>, vector<1x128xf32>
    %4 = vector.broadcast %3 : vector<1x128xf32> to vector<16x128xf32>
    %5 = arith.addf %2, %4 : vector<16x128xf32>
    %cst_5 = arith.constant 0.000000e+00 : f32
    %6 = vector.broadcast %cst_5 : f32 to vector<16x128xf32>
    %7 = arith.maximumf %5, %6 : vector<16x128xf32>
    %c0_6 = arith.constant 0 : index
    %c0_7 = arith.constant 0 : index
    %8 = vector.load %arg4[%c0_6, %c0_7] : memref<16x128xf32, #tpu.memory_space<vmem>>, vector<16x128xf32>
    tpu.vector_store %arg4[%c0_6, %c0_7], %7 {strides = array<i32>} : memref<16x128xf32, #tpu.memory_space<vmem>>, vector<16x128xf32>,
    return
  }
  func.func @transform_0(%arg0: i32) -> (i32, i32) {
    %c0_i32 = arith.constant 0 : i32
    %c0_i32_0 = arith.constant 0 : i32
    return %arg0, %c0_i32 : i32, i32
  }
  func.func @transform_1(%arg0: i32) -> (i32, i32) {
    %c0_i32 = arith.constant 0 : i32
    %c0_i32_0 = arith.constant 0 : i32
    %c0_i32_1 = arith.constant 0 : i32
    return %c0_i32, %c0_i32_0 : i32, i32
  }
  func.func @transform_2(%arg0: i32) -> (i32, i32) {
    %c0_i32 = arith.constant 0 : i32
    %c0_i32_0 = arith.constant 0 : i32
    %c0_i32_1 = arith.constant 0 : i32
    return %c0_i32, %c0_i32_0 : i32, i32
  }
  func.func @transform_3(%arg0: i32) -> (i32, i32) {
    %c0_i32 = arith.constant 0 : i32
    %c0_i32_0 = arith.constant 0 : i32
    return %arg0, %c0_i32 : i32, i32
  }
}

</mosaic_0001>

<bundles_post_ra>
// kernel: encoder_layer_forward.9
= control target key start
LH: loop header
LB: loop body
LE: loop exit
PB: predicated region body
PF: predicated region fallthrough
CT: control target
= control target key end

     0   :  { %v361_v3 = vmov 0.0   ;;  %s555_s1 = inlined_call_operand.vmem [shape: f32[128,384], index: 1, kind: input, shape index: {}]   ;;  %s556_s0 = inlined_call_operand.vmem [shape: f32[16,128], index: 0, kind: input, shape index: {}]   ;;  %s557_s2 = inlined_call_operand.vmem [shape: f32[1,384], index: 2, kind: input, shape index: {}]   ;;  %s558_s3 = inlined_call_operand.vmem [shape: f32[16,384], index: 3, kind: output, shape index: {}]  }
   0x1   :  { %v17_v0 = vld [vmem:[%s555_s1 + $0x8] sm:$0xff]  ;;  %v20_v1 = vld [vmem:[%s555_s1 + $0x20] sm:$0xff]  ;;  %145 = vmatprep.mubr.f32.mxu0 %v361_v3  ;;  %v19_v5 = vld [vmem:[%s555_s1 + $0x18] sm:$0xff] }
   0x2   :  { %v16_v2 = vld [vmem:[%s555_s1] sm:$0xff]  ;;  %v296_v4 = vpack.c.bf16 %v20_v1, %v17_v0  ;;  %v18_v6 = vld [vmem:[%s555_s1 + $0x10] sm:$0xff]  ;;  %v21_v7 = vld [vmem:[%s555_s1 + $0x28] sm:$0xff] }
   0x3   :  { %v298_v8 = vpack.c.bf16 %v19_v5, %v16_v2  ;;  %v328_v9 = vpack.c.bf16 %v21_v7, %v18_v6  ;;  %v23_v10 = vld [vmem:[%s555_s1 + $0x38] sm:$0xff]  ;;  %v26_v11 = vld [vmem:[%s555_s1 + $0x50] sm:$0xff]  ;;  %v25_v14 = vld [vmem:[%s555_s1 + $0x48] sm:$0xff] }
   0x4   :  { %v22_v12 = vld [vmem:[%s555_s1 + $0x30] sm:$0xff]  ;;  %297 = vmatprep.subr.bf16.mxu0 %v296_v4  ;;  %v300_v13 = vpack.c.bf16 %v26_v11, %v23_v10  ;;  %v24_v15 = vld [vmem:[%s555_s1 + $0x40] sm:$0xff]  ;;  %v27_v16 = vld [vmem:[%s555_s1 + $0x58] sm:$0xff] }
   0x5   :  { %299 = vmatpush1.bf16.msra.mxu0 %v298_v8  ;;  %329 = vmatprep.subr.bf16.mxu1 %v328_v9  ;;  %v302_v17 = vpack.c.bf16 %v25_v14, %v22_v12  ;;  %v332_v18 = vpack.c.bf16 %v27_v16, %v24_v15  ;;  %v29_v19 = vld [vmem:[%s555_s1 + $0x68] sm:$0xff]  ;;  %v32_v20 = vld [vmem:[%s555_s1 + $0x80] sm:$0xff]  ;;  %v31_v23 = vld [vmem:[%s555_s1 + $0x78] sm:$0xff]  ;;  %v66_v12 = vlaneseq }
   0x6   :  { %v28_v21 = vld [vmem:[%s555_s1 + $0x60] sm:$0xff]  ;;  %301 = vmatprep.subr.bf16.mxu0 %v300_v13  ;;  %331 = vmatpush3.bf16.msra.mxu1 %v328_v9  ;;  %v304_v22 = vpack.c.bf16 %v32_v20, %v29_v19  ;;  %v30_v24 = vld [vmem:[%s555_s1 + $0x70] sm:$0xff]  ;;  %v33_v25 = vld [vmem:[%s555_s1 + $0x88] sm:$0xff] }
   0x7   :  { %333 = vmatprep.subr.bf16.mxu1 %v332_v18  ;;  %v336_v26 = vpack.c.bf16 %v33_v25, %v30_v24  ;;  %v35_v27 = vld [vmem:[%s555_s1 + $0x98] sm:$0xff]  ;;  %v38_v28 = vld [vmem:[%s555_s1 + $0xb0] sm:$0xff]  ;;  %v36_v29 = vld [vmem:[%s555_s1 + $0xa0] sm:$0xff]  ;;  %v306_v31 = vpack.c.bf16 %v31_v23, %v28_v21  ;;  %v67_v13 = vshrl.u32 %v66_v12, 7 }
   0x8   :  { %v39_v30 = vld [vmem:[%s555_s1 + $0xb8] sm:$0xff]  ;;  %v308_v32 = vpack.c.bf16 %v38_v28, %v35_v27  ;;  %v34_v33 = vld [vmem:[%s555_s1 + $0x90] sm:$0xff]  ;;  %v37_v34 = vld [vmem:[%s555_s1 + $0xa8] sm:$0xff] }
   0x9   :  { %303 = vmatpush1.bf16.msra.mxu0 %v302_v17  ;;  %v340_v35 = vpack.c.bf16 %v39_v30, %v36_v29  ;;  %v41_v36 = vld [vmem:[%s555_s1 + $0xc8] sm:$0xff]  ;;  %v44_v37 = vld [vmem:[%s555_s1 + $0xe0] sm:$0xff]  ;;  %v42_v38 = vld [vmem:[%s555_s1 + $0xd0] sm:$0xff]  ;;  %v310_v40 = vpack.c.bf16 %v37_v34, %v34_v33  ;;  %v68_v14 = vsub.s32 0, %v67_v13  ;;  %v72_v16 = vsub.s32 1, %v67_v13 }
   0xa   :  { %305 = vmatprep.subr.bf16.mxu0 %v304_v22  ;;  %335 = vmatpush3.bf16.msra.mxu1 %v332_v18  ;;  %v45_v39 = vld [vmem:[%s555_s1 + $0xe8] sm:$0xff]  ;;  %v312_v41 = vpack.c.bf16 %v44_v37, %v41_v36  ;;  %v40_v42 = vld [vmem:[%s555_s1 + $0xc0] sm:$0xff]  ;;  %v43_v43 = vld [vmem:[%s555_s1 + $0xd8] sm:$0xff]  ;;  %v76_v17 = vsub.s32 2, %v67_v13 }
   0xb   :  { %337 = vmatprep.subr.bf16.mxu1 %v336_v26  ;;  %v344_v44 = vpack.c.bf16 %v45_v39, %v42_v38  ;;  %v47_v45 = vld [vmem:[%s555_s1 + $0xf8] sm:$0xff]  ;;  %v50_v46 = vld [vmem:[%s555_s1 + $0x110] sm:$0xff]  ;;  %v48_v47 = vld [vmem:[%s555_s1 + $0x100] sm:$0xff]  ;;  %v314_v49 = vpack.c.bf16 %v43_v43, %v40_v42 }
   0xc   :  { %v51_v48 = vld [vmem:[%s555_s1 + $0x118] sm:$0xff]  ;;  %v316_v50 = vpack.c.bf16 %v50_v46, %v47_v45  ;;  %v46_v51 = vld [vmem:[%s555_s1 + $0xf0] sm:$0xff]  ;;  %v49_v52 = vld [vmem:[%s555_s1 + $0x108] sm:$0xff] }
   0xd   :  { %307 = vmatpush1.bf16.msra.mxu0 %v306_v31  ;;  %v14_v53 = vld [vmem:[%s556_s0] sm:$0xff]  ;;  %v348_v54 = vpack.c.bf16 %v51_v48, %v48_v47  ;;  %v53_v55 = vld [vmem:[%s555_s1 + $0x128] sm:$0xff]  ;;  %v54_v57 = vld [vmem:[%s555_s1 + $0x130] sm:$0xff]  ;;  %v318_v59 = vpack.c.bf16 %v49_v52, %v46_v51 }
   0xe   :  { %309 = vmatprep.subr.bf16.mxu0 %v308_v32  ;;  %339 = vmatpush3.bf16.msra.mxu1 %v336_v26  ;;  %v56_v56 = vld [vmem:[%s555_s1 + $0x140] sm:$0xff]  ;;  %v57_v58 = vld [vmem:[%s555_s1 + $0x148] sm:$0xff]  ;;  %v55_v62 = vld [vmem:[%s555_s1 + $0x138] sm:$0xff] }
   0xf   :  { %341 = vmatprep.subr.bf16.mxu1 %v340_v35  ;;  %293 = vmatprep.mubr.f32.mxu1 %v14_v53  ;;  %v320_v60 = vpack.c.bf16 %v56_v56, %v53_v55  ;;  %v52_v61 = vld [vmem:[%s555_s1 + $0x120] sm:$0xff]  ;;  %v352_v63 = vpack.c.bf16 %v57_v58, %v54_v57  ;;  %v59_v0 = vld [vmem:[%s555_s1 + $0x158] sm:$0xff]  ;;  %v62_v1 = vld [vmem:[%s555_s1 + $0x170] sm:$0xff] }
  0x10   :  { %v60_v2 = vld [vmem:[%s555_s1 + $0x160] sm:$0xff]  ;;  %v63_v4 = vld [vmem:[%s555_s1 + $0x178] sm:$0xff]  ;;  %v322_v5 = vpack.c.bf16 %v55_v62, %v52_v61  ;;  %v324_v6 = vpack.c.bf16 %v62_v1, %v59_v0  ;;  %v58_v7 = vld [vmem:[%s555_s1 + $0x150] sm:$0xff] }
  0x11   :  { %311 = vmatpush1.bf16.msra.mxu0 %v310_v40  ;;  %v61_v8 = vld [vmem:[%s555_s1 + $0x168] sm:$0xff]  ;;  %v356_v9 = vpack.c.bf16 %v63_v4, %v60_v2  ;;  %v64_v15 = vld [vmem:[%s557_s2] sm:$0x7] }
  0x12   :  { %313 = vmatprep.subr.bf16.mxu0 %v312_v41  ;;  %343 = vmatpush3.bf16.msra.mxu1 %v340_v35  ;;  %v326_v10 = vpack.c.bf16 %v61_v8, %v58_v7  ;;  %v15_v11 = vld [vmem:[%s556_s0 + $0x8] sm:$0xff]  ;;  %v69_v18 = vrot.slane %v64_v15, %v68_v14  ;;  %v73_v19 = vrot.slane %v64_v15, %v72_v16 }
  0x13   :  { %345 = vmatprep.subr.bf16.mxu1 %v344_v44  ;;  %v77_v20 = vrot.slane %v64_v15, %v76_v17 }
  0x15   :  { %315 = vmatpush1.bf16.msra.mxu0 %v314_v49 }
  0x16   :  { %317 = vmatprep.subr.bf16.mxu0 %v316_v50  ;;  %347 = vmatpush3.bf16.msra.mxu1 %v344_v44 }
  0x17   :  { %349 = vmatprep.subr.bf16.mxu1 %v348_v54 }
  0x19   :  { %319 = vmatpush1.bf16.msra.mxu0 %v318_v59 }
  0x1a   :  { %321 = vmatprep.subr.bf16.mxu0 %v320_v60  ;;  %351 = vmatpush3.bf16.msra.mxu1 %v348_v54 }
  0x1b   :  { %353 = vmatprep.subr.bf16.mxu1 %v352_v63 }
  0x1d   :  { %323 = vmatpush1.bf16.msra.mxu0 %v322_v5 }
  0x1e   :  { %325 = vmatprep.subr.bf16.mxu0 %v324_v6  ;;  %355 = vmatpush3.bf16.msra.mxu1 %v352_v63 }
  0x1f   :  { %357 = vmatprep.subr.bf16.mxu1 %v356_v9 }
  0x21   :  { %327 = vmatpush1.bf16.msra.mxu0 %v326_v10 }
  0x22   :  { %359 = vmatpush3.bf16.msra.mxu1 %v356_v9 }
  0x24   :  { %146 = vmatmul.mubr.f32.vlgmr.msra.gmra.mrb[0].mxu0 %v14_v53 }
  0x25   :  { %151 = vmatprep.mubr.f32.mxu0 %v361_v3  ;;  %294 = vmatmul.mubr.f32.vlgmr.msra.gmra.mrb[0].mxu1 %v15_v11 }
  0x28   :  { %152 = vmatmul.mubr.f32.gmra.mrb[2].mxu0 %v15_v11 }
  0xf7   :  { %v147_v21 = vpop.f32.mrb[0].mxu0 }
  0xf8   :  { %v148_v22 = vadd.f32 %v147_v21, %v69_v18  ;;  %v149_v23 = vpop.f32.mrb[1].mxu0  ;;  %v295_v24 = vpop.f32.mrb[0].mxu1 }
  0xf9   :  { %v150_v25 = vadd.f32 %v149_v23, %v73_v19  ;;  %v230_v3 = vadd.f32 %v295_v24, %v77_v20  ;;  %v224_v26 = vpop.f32.mrb[1].mxu1 }
  0xfa   :  { %233 = vst [vmem:[%s558_s3] sm:$0xff] %v148_v22  ;;  %v225_v27 = vadd.f32 %v224_v26, %v77_v20 }
  0xfb   :  { %234 = vst [vmem:[%s558_s3 + $0x8] sm:$0xff] %v150_v25  ;;  %238 = vst [vmem:[%s558_s3 + $0x28] sm:$0xff] %v230_v3  ;;  %v153_v28 = vpop.f32.mrb[2].mxu0 }
  0xfc   :  { %v154_v29 = vadd.f32 %v153_v28, %v69_v18  ;;  %235 = vst [vmem:[%s558_s3 + $0x10] sm:$0xff] %v225_v27  ;;  %v155_v30 = vpop.f32.mrb[3].mxu0 }
  0xfd   :  { %v156_v31 = vadd.f32 %v155_v30, %v73_v19 }
  0xfe   :  { %236 = vst [vmem:[%s558_s3 + $0x18] sm:$0xff] %v154_v29 }
  0xff   :  { %237 = vst [vmem:[%s558_s3 + $0x20] sm:$0xff] %v156_v31 }

// kernel: encoder_layer_forward.11
= control target key start
LH: loop header
LB: loop body
LE: loop exit
PB: predicated region body
PF: predicated region fallthrough
CT: control target
= control target key end

     0   :  { %s307_s1 = inlined_call_operand.vmem [shape: f32[128,128], index: 1, kind: input, shape index: {}]   ;;  %s308_s0 = inlined_call_operand.vmem [shape: f32[16,128], index: 0, kind: input, shape index: {}]   ;;  %s309_s2 = inlined_call_operand.vmem [shape: f32[1,128], index: 2, kind: input, shape index: {}]   ;;  %s310_s3 = inlined_call_operand.vmem [shape: f32[16,128], index: 3, kind: input, shape index: {}]   ;;  %s311_s4 = inlined_call_operand.vmem [shape: f32[16,128], index: 4, kind: output, shape index: {}]  }
   0x1   :  { %v19_v0 = vld [vmem:[%s307_s1] sm:$0xff]  ;;  %v20_v1 = vld [vmem:[%s307_s1 + $0x8] sm:$0xff]  ;;  %v21_v2 = vld [vmem:[%s307_s1 + $0x10] sm:$0xff] }
   0x2   :  { %v181_v3 = vpack.c.bf16 %v20_v1, %v19_v0  ;;  %v22_v4 = vld [vmem:[%s307_s1 + $0x18] sm:$0xff]  ;;  %v23_v6 = vld [vmem:[%s307_s1 + $0x20] sm:$0xff]  ;;  %v24_v7 = vld [vmem:[%s307_s1 + $0x28] sm:$0xff] }
   0x3   :  { %v185_v5 = vpack.c.bf16 %v22_v4, %v21_v2  ;;  %v189_v8 = vpack.c.bf16 %v24_v7, %v23_v6  ;;  %v17_v9 = vld [vmem:[%s308_s0] sm:$0xff]  ;;  %v25_v10 = vld [vmem:[%s307_s1 + $0x30] sm:$0xff]  ;;  %v26_v11 = vld [vmem:[%s307_s1 + $0x38] sm:$0xff] }
   0x4   :  { %182 = vmatprep.subr.bf16.mxu0 %v181_v3  ;;  %178 = vmatprep.mubr.f32.mxu0 %v17_v9  ;;  %v193_v12 = vpack.c.bf16 %v26_v11, %v25_v10  ;;  %v27_v13 = vld [vmem:[%s307_s1 + $0x40] sm:$0xff]  ;;  %v28_v14 = vld [vmem:[%s307_s1 + $0x48] sm:$0xff]  ;;  %v29_v16 = vld [vmem:[%s307_s1 + $0x50] sm:$0xff] }
   0x5   :  { %184 = vmatpush3.bf16.msra.mxu0 %v181_v3  ;;  %v197_v15 = vpack.c.bf16 %v28_v14, %v27_v13  ;;  %v30_v17 = vld [vmem:[%s307_s1 + $0x58] sm:$0xff]  ;;  %v31_v19 = vld [vmem:[%s307_s1 + $0x60] sm:$0xff]  ;;  %v32_v20 = vld [vmem:[%s307_s1 + $0x68] sm:$0xff] }
   0x6   :  { %186 = vmatprep.subr.bf16.mxu0 %v185_v5  ;;  %v201_v18 = vpack.c.bf16 %v30_v17, %v29_v16  ;;  %v205_v21 = vpack.c.bf16 %v32_v20, %v31_v19  ;;  %v33_v22 = vld [vmem:[%s307_s1 + $0x70] sm:$0xff]  ;;  %v34_v23 = vld [vmem:[%s307_s1 + $0x78] sm:$0xff]  ;;  %v18_v25 = vld [vmem:[%s308_s0 + $0x8] sm:$0xff] }
   0x7   :  { %v209_v24 = vpack.c.bf16 %v34_v23, %v33_v22  ;;  %v127_v26 = vld [vmem:[%s309_s2] ss:$0 sm:$0xff]  ;;  %v118_v28 = vld [vmem:[%s310_s3 + $0x8] sm:$0xff] }
   0x8   :  { %v117_v31 = vld [vmem:[%s310_s3] sm:$0xff] }
   0x9   :  { %188 = vmatpush3.bf16.msra.mxu0 %v185_v5 }
   0xa   :  { %190 = vmatprep.subr.bf16.mxu0 %v189_v8 }
   0xd   :  { %192 = vmatpush3.bf16.msra.mxu0 %v189_v8 }
   0xe   :  { %194 = vmatprep.subr.bf16.mxu0 %v193_v12 }
  0x11   :  { %196 = vmatpush3.bf16.msra.mxu0 %v193_v12 }
  0x12   :  { %198 = vmatprep.subr.bf16.mxu0 %v197_v15 }
  0x15   :  { %200 = vmatpush3.bf16.msra.mxu0 %v197_v15 }
  0x16   :  { %202 = vmatprep.subr.bf16.mxu0 %v201_v18 }
  0x19   :  { %204 = vmatpush3.bf16.msra.mxu0 %v201_v18 }
  0x1a   :  { %206 = vmatprep.subr.bf16.mxu0 %v205_v21 }
  0x1d   :  { %208 = vmatpush3.bf16.msra.mxu0 %v205_v21 }
  0x1e   :  { %210 = vmatprep.subr.bf16.mxu0 %v209_v24 }
  0x21   :  { %212 = vmatpush3.bf16.msra.mxu0 %v209_v24 }
  0x24   :  { %179 = vmatmul.mubr.f32.vlgmr.msra.gmra.mrb[0].mxu0 %v18_v25 }
  0xf7   :  { %v180_v27 = vpop.f32.mrb[0].mxu0 }
  0xf8   :  { %v114_v29 = vadd.f32 %v180_v27, %v127_v26  ;;  %v108_v30 = vpop.f32.mrb[1].mxu0 }
  0xf9   :  { %v109_v32 = vadd.f32 %v127_v26, %v108_v30 }
  0xfa   :  { %v120_v33 = vadd.f32 %v118_v28, %v114_v29 }
  0xfb   :  { %v119_v34 = vadd.f32 %v117_v31, %v109_v32 }
  0xfc   :  { %122 = vst [vmem:[%s311_s4 + $0x8] sm:$0xff] %v120_v33 }
  0xfd   :  { %121 = vst [vmem:[%s311_s4] sm:$0xff] %v119_v34 }

// kernel: encoder_layer_forward.12
= control target key start
LH: loop header
LB: loop body
LE: loop exit
PB: predicated region body
PF: predicated region fallthrough
CT: control target
= control target key end

     0   :  { %v59_v0 = vmov 0.0   ;;  %s103_s1 = inlined_call_operand.vmem [shape: f32[2,128], index: 1, kind: output, shape index: {}]   ;;  %s104_s0 = inlined_call_operand.vmem [shape: f32[16,128], index: 0, kind: input, shape index: {}]  }
   0x1   :  { %12 = vst [vmem:[%s103_s1] sm:$0x3] %v59_v0  ;;  %v13_v1 = vld [vmem:[%s104_s0] sm:$0xff]  ;;  %v14_v2 = vld [vmem:[%s104_s0 + $0x8] sm:$0xff] }
   0x2   :  { %v16_v3 = vadd.f32 %v14_v2, %v13_v1  ;;  %v26_v4 = vmul.f32 %v13_v1, %v13_v1  ;;  %v27_v5 = vmul.f32 %v14_v2, %v14_v2 }
   0x4   :  { %v17_v6 = vrot.slane %v16_v3, 4  ;;  %v28_v7 = vadd.f32 %v27_v5, %v26_v4 }
   0x6   :  { %v18_v8 = vadd.f32 %v17_v6, %v16_v3  ;;  %v29_v9 = vrot.slane %v28_v7, 4 }
   0x8   :  { %v19_v10 = vrot.slane %v18_v8, 2  ;;  %v30_v11 = vadd.f32 %v29_v9, %v28_v7  ;;  %v15_v16 = vld [vmem:[%s103_s1] sm:$0x1]  ;;  %v25_v21 = vld [vmem:[%s103_s1 + $0x1] sm:$0x1] }
   0xa   :  { %v20_v12 = vadd.f32 %v19_v10, %v18_v8  ;;  %v31_v13 = vrot.slane %v30_v11, 2 }
   0xc   :  { %v21_v14 = vrot.slane %v20_v12, 1  ;;  %v32_v15 = vadd.f32 %v31_v13, %v30_v11 }
   0xe   :  { %v22_v17 = vadd.f32 %v21_v14, %v20_v12  ;;  %v33_v18 = vrot.slane %v32_v15, 1 }
  0x10   :  { %v23_v19 = vadd.f32 %v22_v17, %v15_v16  ;;  %v34_v20 = vadd.f32 %v33_v18, %v32_v15 }
  0x12   :  { %24 = vst [vmem:[%s103_s1] sm:$0x1] %v23_v19  ;;  %v35_v22 = vadd.f32 %v34_v20, %v25_v21 }
  0x14   :  { %36 = vst [vmem:[%s103_s1 + $0x1] sm:$0x1] %v35_v22 }
  0x19   :  { %v40_v23 = vld [vmem:[%s103_s1] sm:$0x1] }
  0x1a   :  { %v43_v24 = vmul.f32 0.0625, %v40_v23 }
  0x1b   :  { %v41_v25 = vld [vmem:[%s103_s1 + $0x1] sm:$0x1] }
  0x1c   :  { %v45_v26 = vmul.f32 %v43_v24, %v43_v24  ;;  %48 = vst [vmem:[%s103_s1] sm:$0x1] %v43_v24  ;;  %v44_v27 = vmul.f32 0.0625, %v41_v25 }
  0x1e   :  { %v46_v28 = vsub.f32 %v44_v27, %v45_v26 }
  0x20   :  { %v47_v29 = vmax.f32 %v46_v28, 0.0 }
  0x22   :  { %v49_v30 = vadd.f32 1e-05, %v47_v29 }
  0x24   :  { %57 = vrsqrt.f32 %v49_v30 }
  0x2e   :  { %v58_v31 = vpop.eup %57 }
  0x2f   :  { %51 = vst [vmem:[%s103_s1 + $0x1] sm:$0x1] %v58_v31 }

// kernel: encoder_layer_forward.10
= control target key start
LH: loop header
LB: loop body
LE: loop exit
PB: predicated region body
PF: predicated region fallthrough
CT: control target
= control target key end

     0   :  { %vm11_vm0 = vcmask 261120   ;;  %v1553_v0 = vmov 0.0   ;;  %vm1554_vm1 = vmmov 0   ;;  %vm89_vm2 = vcmask 64512   ;;  %s1555_s10 = smov 96   ;;  %s1556_s11 = smov 64   ;;  %s1719_s0 = inlined_call_operand.vmem [shape: f32[2,8,384], index: 0, kind: input, shape index: {}]   ;;  %s1720_s1 = inlined_call_operand.vmem [shape: f32[2,8,128], index: 1, kind: output, shape index: {}]  }
   0x1   :  { %1436 = vmatprep.subr.mxu0 %v1553_v0  ;;  %v9_v1 = vld [vmem:[%s1719_s0 + $0x8] sm:$0xff]  ;;  %1438 = vmatprep.mubr.msk.f32.mxu0 %vm1554_vm1, %v1553_v0  ;;  %v8_v2 = vld [vmem:[%s1719_s0] sm:$0xff]  ;;  %s1557_s12 = smov 32   ;;  %v1388_v8 = vld [vmem:[%s1719_s0 + $0x18] sm:$0xff]  ;;  %vm686_vm3 = vcmask 523264   ;;  %vm688_vm4 = vcmask 785408  }
   0x2   :  { %1437 = vmatpush3.xpose.msk.msra.mxu0 %vm11_vm0, %v9_v1  ;;  %1441 = vmatprep.subr.mxu1 %v1553_v0  ;;  %v1389_v7 = vld [vmem:[%s1719_s0 + $0x20] sm:$0xff]  ;;  %v1605_v14 = vld [vmem:[%s1719_s0 + $0x10] sm:$0xff] }
   0x3   :  { %1443 = vmatprep.mubr.msk.f32.mxu1 %vm1554_vm1, %v1553_v0  ;;  %1451 = vmatprep.subr.mxu0 %v1553_v0 }
   0x4   :  { %176 = vrot.lane.b32.xlu1 %v9_v1, %s1555_s10  ;;  %1442 = vmatpush3.msra.mxu1 %v1605_v14 }
   0x5   :  { %1439 = vmatmul.mubr.msk.f32.vlgmr.msra.gmra.mrb[0].mxu0 %vm11_vm0, %v8_v2  ;;  %1446 = vmatprep.subr.mxu1 %v1553_v0 }
   0x6   :  { %1453 = vmatprep.mubr.msk.f32.mxu0 %vm1554_vm1, %v1553_v0 }
   0x8   :  { %174 = vrot.lane.b32.xlu1 %v8_v2, %s1555_s10 }
   0xc   :  { %341 = vrot.lane.b32.xlu1 %v8_v2, %s1556_s11 }
  0x10   :  { %509 = vrot.lane.b32.xlu1 %v9_v1, %s1557_s12 }
  0x14   :  { %507 = vrot.lane.b32.xlu1 %v8_v2, %s1557_s12 }
  0x18   :  { %858 = vrot.lane.b32.xlu1 %v1389_v7, %s1555_s10 }
  0x1c   :  { %856 = vrot.lane.b32.xlu1 %v1388_v8, %s1555_s10 }
  0x20   :  { %1025 = vrot.lane.b32.xlu1 %v1389_v7, %s1556_s11 }
  0x24   :  { %1191 = vrot.lane.b32.xlu1 %v1389_v7, %s1557_s12 }
  0x76   :  { %v177_v15 = vpop.permute.xlu1 %176 }
  0x7a   :  { %v175_v16 = vpop.permute.xlu1 %174 }
  0x7e   :  { %v342_v18 = vpop.permute.xlu1 %341 }
  0x82   :  { %v510_v19 = vpop.permute.xlu1 %509 }
  0x86   :  { %v508_v22 = vpop.permute.xlu1 %507 }
  0x8a   :  { %v859_v24 = vpop.permute.xlu1 %858 }
  0x8e   :  { %v857_v25 = vpop.permute.xlu1 %856 }
  0x92   :  { %v1026_v26 = vpop.permute.xlu1 %1025 }
  0x96   :  { %v1192_v28 = vpop.permute.xlu1 %1191 }
  0xd8   :  { %v84_v3 = vpop.f32.mrb[0].mxu0 }
  0xd9   :  { %v88_v4 = vmul.f32 0.17677669, %v84_v3  ;;  %v1440_v5 = vpop.f32.mrb[1].mxu0 }
  0xdb   :  { %v90_v6 = vsel %vm89_vm2, %v88_v4, -inf }
  0xdc   :  { %91 = vmax.xlane.f32.xlu0 %v90_v6 }
 0x169   :  { %v92_v9 = vpop.xlane.xlu0 %91 }
 0x16a   :  { %v93_v10 = vsub.f32 %v88_v4, %v92_v9 }
 0x16c   :  { %v94_v11 = vmul.f32 1.442695, %v93_v10 }
 0x16e   :  { %1521 = vpow2.f32 %v94_v11 }
 0x178   :  { %v1522_v12 = vpop.eup %1521 }
 0x179   :  { %v96_v13 = vsel %vm89_vm2, %v1522_v12, 0.0 }
 0x17a   :  { %97 = vadd.xlane.f32.xlu0 %v96_v13 }
 0x190   :  { %343 = vrot.lane.b32.xlu0 %v9_v1, %s1556_s11 }
 0x194   :  { %1023 = vrot.lane.b32.xlu0 %v1388_v8, %s1556_s11 }
 0x198   :  { %1189 = vrot.lane.b32.xlu0 %v1388_v8, %s1557_s12 }
 0x207   :  { %v98_v17 = vpop.xlane.xlu0 %97 }
 0x208   :  { %1523 = vrcp.f32 %v98_v17 }
 0x20b   :  { %v344_v23 = vpop.permute.xlu0 %343 }
 0x20f   :  { %v1024_v27 = vpop.permute.xlu0 %1023 }
 0x212   :  { %v1524_v20 = vpop.eup %1523 }
 0x213   :  { %v100_v21 = vmul.f32 %v1524_v20, %v1522_v12  ;;  %v1190_v29 = vpop.permute.xlu0 %1189 }
 0x215   :  { %1444 = vmatmul.mubr.msk.f32.vlgmr.msra.gmra.mrb[0].mxu1 %vm89_vm2, %v100_v21 }
 0x216   :  { %1447 = vmatpush3.xpose.msk.msra.mxu1 %vm11_vm0, %v177_v15  ;;  %1448 = vmatprep.mubr.msk.f32.mxu1 %vm1554_vm1, %v1553_v0 }
 0x217   :  { %1456 = vmatprep.subr.mxu1 %v1553_v0 }
 0x219   :  { %1449 = vmatmul.mubr.msk.f32.vlgmr.msra.gmra.mrb[2].mxu1 %vm11_vm0, %v175_v16 }
 0x21a   :  { %1457 = vmatpush3.xpose.msk.msra.mxu1 %vm11_vm0, %v344_v23  ;;  %1458 = vmatprep.mubr.msk.f32.mxu1 %vm1554_vm1, %v1553_v0 }
 0x21b   :  { %1466 = vmatprep.subr.mxu1 %v1553_v0 }
 0x21d   :  { %1459 = vmatmul.mubr.msk.f32.vlgmr.msra.gmra.mrb[4].mxu1 %vm11_vm0, %v342_v18 }
 0x21e   :  { %1467 = vmatpush3.xpose.msk.msra.mxu1 %vm11_vm0, %v510_v19  ;;  %1468 = vmatprep.mubr.msk.f32.mxu1 %vm1554_vm1, %v1553_v0 }
 0x21f   :  { %1476 = vmatprep.subr.mxu1 %v1553_v0 }
 0x221   :  { %1469 = vmatmul.mubr.msk.f32.vlgmr.msra.gmra.mrb[6].mxu1 %vm11_vm0, %v508_v22 }
 0x222   :  { %1477 = vmatpush3.xpose.msk.msra.mxu1 %vm11_vm0, %v1389_v7  ;;  %1478 = vmatprep.mubr.msk.f32.mxu1 %vm1554_vm1, %v1553_v0 }
 0x223   :  { %1486 = vmatprep.subr.mxu1 %v1553_v0 }
 0x225   :  { %1479 = vmatmul.mubr.msk.f32.vlgmr.msra.gmra.mrb[8].mxu1 %vm11_vm0, %v1388_v8 }
 0x226   :  { %1487 = vmatpush3.xpose.msk.msra.mxu1 %vm11_vm0, %v859_v24  ;;  %1488 = vmatprep.mubr.msk.f32.mxu1 %vm1554_vm1, %v1553_v0 }
 0x227   :  { %1496 = vmatprep.subr.mxu1 %v1553_v0 }
 0x229   :  { %1489 = vmatmul.mubr.msk.f32.vlgmr.msra.gmra.mrb[10].mxu1 %vm11_vm0, %v857_v25 }
 0x22a   :  { %1497 = vmatpush3.xpose.msk.msra.mxu1 %vm11_vm0, %v1026_v26  ;;  %1498 = vmatprep.mubr.msk.f32.mxu1 %vm1554_vm1, %v1553_v0 }
 0x22b   :  { %1506 = vmatprep.subr.mxu1 %v1553_v0 }
 0x22d   :  { %1499 = vmatmul.mubr.msk.f32.vlgmr.msra.gmra.mrb[12].mxu1 %vm11_vm0, %v1024_v27 }
 0x22e   :  { %1507 = vmatpush3.xpose.msk.msra.mxu1 %vm11_vm0, %v1192_v28  ;;  %1508 = vmatprep.mubr.msk.f32.mxu1 %vm1554_vm1, %v1553_v0  ;;  %v1390_v28 = vld [vmem:[%s1719_s0 + $0x28] sm:$0xff] }
 0x231   :  { %1509 = vmatmul.mubr.msk.f32.vlgmr.msra.gmra.mrb[14].mxu1 %vm11_vm0, %v1190_v29 }
 0x2e8   :  { %v1647_v30 = vpop.f32.mrb[0].mxu1 }
 0x2e9   :  { %v1445_v31 = vpop.f32.mrb[1].mxu1 }
 0x2ec   :  { %v248_v32 = vpop.f32.mrb[2].mxu1 }
 0x2ed   :  { %v252_v33 = vmul.f32 0.17677669, %v248_v32  ;;  %v1450_v34 = vpop.f32.mrb[3].mxu1 }
 0x2ef   :  { %v253_v35 = vsel %vm89_vm2, %v252_v33, -inf }
 0x2f0   :  { %254 = vmax.xlane.f32.xlu1 %v253_v35  ;;  %v415_v36 = vpop.f32.mrb[4].mxu1 }
 0x2f1   :  { %v419_v37 = vmul.f32 0.17677669, %v415_v36  ;;  %v1460_v38 = vpop.f32.mrb[5].mxu1 }
 0x2f3   :  { %v420_v39 = vsel %vm89_vm2, %v419_v37, -inf }
 0x2f4   :  { %421 = vmax.xlane.f32.xlu0 %v420_v39  ;;  %v581_v40 = vpop.f32.mrb[6].mxu1 }
 0x2f5   :  { %v585_v41 = vmul.f32 0.17677669, %v581_v40  ;;  %v1470_v42 = vpop.f32.mrb[7].mxu1 }
 0x2f7   :  { %v586_v43 = vsel %vm89_vm2, %v585_v41, -inf }
 0x2f8   :  { %587 = vmax.xlane.f32.xlu0 %v586_v43  ;;  %v767_v44 = vpop.f32.mrb[8].mxu1 }
 0x2f9   :  { %v771_v45 = vmul.f32 0.17677669, %v767_v44  ;;  %v1480_v46 = vpop.f32.mrb[9].mxu1 }
 0x2fb   :  { %v772_v47 = vsel %vm89_vm2, %v771_v45, -inf }
 0x2fc   :  { %773 = vmax.xlane.f32.xlu1 %v772_v47  ;;  %v930_v48 = vpop.f32.mrb[10].mxu1 }
 0x2fd   :  { %v934_v49 = vmul.f32 0.17677669, %v930_v48  ;;  %v1490_v50 = vpop.f32.mrb[11].mxu1 }
 0x2ff   :  { %v935_v51 = vsel %vm89_vm2, %v934_v49, -inf }
 0x300   :  { %936 = vmax.xlane.f32.xlu0 %v935_v51  ;;  %v1097_v52 = vpop.f32.mrb[12].mxu1 }
 0x301   :  { %v1101_v53 = vmul.f32 0.17677669, %v1097_v52  ;;  %v1500_v54 = vpop.f32.mrb[13].mxu1 }
 0x303   :  { %v1102_v55 = vsel %vm89_vm2, %v1101_v53, -inf }
 0x304   :  { %1103 = vmax.xlane.f32.xlu1 %v1102_v55  ;;  %v1263_v56 = vpop.f32.mrb[14].mxu1 }
 0x305   :  { %v1267_v57 = vmul.f32 0.17677669, %v1263_v56  ;;  %v1510_v58 = vpop.f32.mrb[15].mxu1 }
 0x307   :  { %v1268_v59 = vsel %vm89_vm2, %v1267_v57, -inf }
 0x308   :  { %1269 = vmax.xlane.f32.xlu0 %v1268_v59 }
 0x315   :  { %431 = vrot.lane.b32.xlu1 %v1605_v14, %s1556_s11 }
 0x319   :  { %597 = vrot.lane.b32.xlu1 %v1605_v14, %s1557_s12 }
 0x31e   :  { %265 = vrot.lane.b32.xlu0 %v1605_v14, %s1555_s10 }
 0x37d   :  { %v255_v60 = vpop.xlane.xlu1 %254 }
 0x37e   :  { %v256_v61 = vsub.f32 %v252_v33, %v255_v60 }
 0x380   :  { %v257_v62 = vmul.f32 1.442695, %v256_v61 }
 0x381   :  { %v422_v63 = vpop.xlane.xlu0 %421 }
 0x382   :  { %1525 = vpow2.f32 %v257_v62  ;;  %v423_v1 = vsub.f32 %v419_v37, %v422_v63 }
 0x384   :  { %v424_v2 = vmul.f32 1.442695, %v423_v1 }
 0x385   :  { %v588_v3 = vpop.xlane.xlu0 %587 }
 0x386   :  { %1527 = vpow2.f32 %v424_v2  ;;  %v589_v4 = vsub.f32 %v585_v41, %v588_v3 }
 0x388   :  { %v590_v5 = vmul.f32 1.442695, %v589_v4 }
 0x389   :  { %v774_v6 = vpop.xlane.xlu1 %773 }
 0x38a   :  { %1529 = vpow2.f32 %v590_v5  ;;  %v775_v7 = vsub.f32 %v771_v45, %v774_v6 }
 0x38c   :  { %v1526_v8 = vpop.eup %1525  ;;  %v776_v9 = vmul.f32 1.442695, %v775_v7 }
 0x38d   :  { %v937_v10 = vpop.xlane.xlu0 %936  ;;  %v259_v11 = vsel %vm89_vm2, %v1526_v8, 0.0 }
 0x38e   :  { %1531 = vpow2.f32 %v776_v9  ;;  %v938_v12 = vsub.f32 %v934_v49, %v937_v10  ;;  %260 = vadd.xlane.f32.xlu1 %v259_v11 }
 0x390   :  { %v1528_v13 = vpop.eup %1527  ;;  %v939_v14 = vmul.f32 1.442695, %v938_v12 }
 0x391   :  { %v426_v15 = vsel %vm89_vm2, %v1528_v13, 0.0  ;;  %v1104_v29 = vpop.xlane.xlu1 %1103 }
 0x392   :  { %1533 = vpow2.f32 %v939_v14  ;;  %427 = vadd.xlane.f32.xlu0 %v426_v15  ;;  %v1105_v31 = vsub.f32 %v1101_v53, %v1104_v29 }
 0x394   :  { %v1530_v16 = vpop.eup %1529  ;;  %v1106_v32 = vmul.f32 1.442695, %v1105_v31 }
 0x395   :  { %v1270_v17 = vpop.xlane.xlu0 %1269  ;;  %v592_v18 = vsel %vm89_vm2, %v1530_v16, 0.0  ;;  %v432_v35 = vpop.permute.xlu1 %431 }
 0x396   :  { %v1271_v19 = vsub.f32 %v1267_v57, %v1270_v17  ;;  %593 = vadd.xlane.f32.xlu1 %v592_v18 }
 0x398   :  { %v1532_v20 = vpop.eup %1531  ;;  %v1272_v21 = vmul.f32 1.442695, %v1271_v19 }
 0x399   :  { %v778_v22 = vsel %vm89_vm2, %v1532_v20, 0.0  ;;  %v266_v23 = vpop.permute.xlu0 %265  ;;  %v598_v36 = vpop.permute.xlu1 %597 }
 0x39a   :  { %1535 = vpow2.f32 %v1272_v21  ;;  %779 = vadd.xlane.f32.xlu0 %v778_v22  ;;  %1452 = vmatpush3.msra.mxu0 %v266_v23 }
 0x39b   :  { %1461 = vmatprep.subr.mxu0 %v1553_v0  ;;  %1537 = vpow2.f32 %v1106_v32 }
 0x39c   :  { %v1534_v24 = vpop.eup %1533 }
 0x39d   :  { %v941_v25 = vsel %vm89_vm2, %v1534_v24, 0.0 }
 0x39e   :  { %942 = vadd.xlane.f32.xlu1 %v941_v25 }
 0x3a4   :  { %v1668_v26 = vpop.eup %1535 }
 0x3a5   :  { %v1274_v27 = vsel %vm89_vm2, %v1668_v26, 0.0  ;;  %v1538_v33 = vpop.eup %1537 }
 0x3a6   :  { %1275 = vadd.xlane.f32.xlu1 %v1274_v27  ;;  %v1108_v34 = vsel %vm89_vm2, %v1538_v33, 0.0 }
 0x3b0   :  { %947 = vrot.lane.b32.xlu0 %v1390_v28, %s1555_s10 }
 0x3b7   :  { %1113 = vrot.lane.b32.xlu1 %v1390_v28, %s1556_s11 }
 0x3cf   :  { %1109 = vadd.xlane.f32.xlu0 %v1108_v34 }
 0x3e5   :  { %1279 = vrot.lane.b32.xlu0 %v1390_v28, %s1557_s12 }
 0x41b   :  { %v261_v37 = vpop.xlane.xlu1 %260 }
 0x41c   :  { %1539 = vrcp.f32 %v261_v37 }
 0x41f   :  { %v428_v38 = vpop.xlane.xlu0 %427 }
 0x420   :  { %1541 = vrcp.f32 %v428_v38 }
 0x423   :  { %v594_v39 = vpop.xlane.xlu1 %593 }
 0x424   :  { %1543 = vrcp.f32 %v594_v39 }
 0x426   :  { %v1540_v40 = vpop.eup %1539 }
 0x427   :  { %v263_v41 = vmul.f32 %v1540_v40, %v1526_v8  ;;  %v780_v42 = vpop.xlane.xlu0 %779 }
 0x428   :  { %1545 = vrcp.f32 %v780_v42 }
 0x429   :  { %1454 = vmatmul.mubr.msk.f32.vlgmr.msra.gmra.mrb[2].mxu0 %vm89_vm2, %v263_v41 }
 0x42a   :  { %v1542_v43 = vpop.eup %1541  ;;  %1462 = vmatpush3.msra.mxu0 %v432_v35  ;;  %1463 = vmatprep.mubr.msk.f32.mxu0 %vm1554_vm1, %v1553_v0 }
 0x42b   :  { %v430_v44 = vmul.f32 %v1542_v43, %v1528_v13  ;;  %v943_v45 = vpop.xlane.xlu1 %942  ;;  %1471 = vmatprep.subr.mxu0 %v1553_v0  ;;  %v948_v51 = vpop.permute.xlu0 %947 }
 0x42c   :  { %1547 = vrcp.f32 %v943_v45 }
 0x42d   :  { %1464 = vmatmul.mubr.msk.f32.vlgmr.msra.gmra.mrb[4].mxu0 %vm89_vm2, %v430_v44 }
 0x42e   :  { %v1544_v46 = vpop.eup %1543  ;;  %1472 = vmatpush3.msra.mxu0 %v598_v36  ;;  %1473 = vmatprep.mubr.msk.f32.mxu0 %vm1554_vm1, %v1553_v0 }
 0x42f   :  { %v596_v47 = vmul.f32 %v1544_v46, %v1530_v16  ;;  %1481 = vmatprep.subr.mxu0 %v1553_v0 }
 0x431   :  { %1474 = vmatmul.mubr.msk.f32.vlgmr.msra.gmra.mrb[6].mxu0 %vm89_vm2, %v596_v47 }
 0x432   :  { %v1546_v48 = vpop.eup %1545  ;;  %1482 = vmatpush3.msra.mxu0 %v1390_v28  ;;  %1483 = vmatprep.mubr.msk.f32.mxu0 %vm1554_vm1, %v1553_v0 }
 0x433   :  { %v782_v49 = vmul.f32 %v1546_v48, %v1532_v20  ;;  %v1276_v50 = vpop.xlane.xlu1 %1275  ;;  %1491 = vmatprep.subr.mxu0 %v1553_v0 }
 0x435   :  { %1484 = vmatmul.mubr.msk.f32.vlgmr.msra.gmra.mrb[8].mxu0 %vm89_vm2, %v782_v49 }
 0x436   :  { %v1548_v52 = vpop.eup %1547  ;;  %1492 = vmatpush3.msra.mxu0 %v948_v51  ;;  %1493 = vmatprep.mubr.msk.f32.mxu0 %vm1554_vm1, %v1553_v0 }
 0x437   :  { %v945_v53 = vmul.f32 %v1548_v52, %v1534_v24  ;;  %v1114_v54 = vpop.permute.xlu1 %1113  ;;  %1501 = vmatprep.subr.mxu0 %v1553_v0 }
 0x439   :  { %1494 = vmatmul.mubr.msk.f32.vlgmr.msra.gmra.mrb[10].mxu0 %vm89_vm2, %v945_v53 }
 0x43a   :  { %1502 = vmatpush3.msra.mxu0 %v1114_v54  ;;  %1503 = vmatprep.mubr.msk.f32.mxu0 %vm1554_vm1, %v1553_v0 }
 0x43b   :  { %1511 = vmatprep.subr.mxu0 %v1553_v0 }
 0x45c   :  { %v1110_v55 = vpop.xlane.xlu0 %1109 }
 0x45d   :  { %1549 = vrcp.f32 %v1110_v55 }
 0x45e   :  { %1551 = vrcp.f32 %v1276_v50 }
 0x460   :  { %v1280_v58 = vpop.permute.xlu0 %1279 }
 0x467   :  { %v1550_v56 = vpop.eup %1549 }
 0x468   :  { %v1112_v57 = vmul.f32 %v1550_v56, %v1538_v33  ;;  %v1552_v59 = vpop.eup %1551 }
 0x469   :  { %v1278_v60 = vmul.f32 %v1552_v59, %v1668_v26 }
 0x46a   :  { %1504 = vmatmul.mubr.msk.f32.vlgmr.msra.gmra.mrb[12].mxu0 %vm89_vm2, %v1112_v57 }
 0x46b   :  { %1512 = vmatpush3.msra.mxu0 %v1280_v58  ;;  %1513 = vmatprep.mubr.msk.f32.mxu0 %vm1554_vm1, %v1553_v0 }
 0x46e   :  { %1514 = vmatmul.mubr.msk.f32.vlgmr.msra.gmra.mrb[14].mxu0 %vm89_vm2, %v1278_v60 }
 0x4fc   :  { %v337_v61 = vpop.f32.mrb[2].mxu0 }
 0x4fd   :  { %674 = vrot.lane.b32.xlu1 %v337_v61, %s1557_s12  ;;  %v1455_v62 = vpop.f32.mrb[3].mxu0 }
 0x500   :  { %v503_v63 = vpop.f32.mrb[4].mxu0 }
 0x501   :  { %678 = vrot.lane.b32.xlu0 %v503_v63, %s1556_s11  ;;  %v1465_v1 = vpop.f32.mrb[5].mxu0 }
 0x504   :  { %v669_v2 = vpop.f32.mrb[6].mxu0 }
 0x505   :  { %682 = vrot.lane.b32.xlu1 %v669_v2, %s1555_s10  ;;  %v1475_v3 = vpop.f32.mrb[7].mxu0 }
 0x508   :  { %v852_v4 = vpop.f32.mrb[8].mxu0 }
 0x509   :  { %v1485_v5 = vpop.f32.mrb[9].mxu0 }
 0x50c   :  { %v1019_v6 = vpop.f32.mrb[10].mxu0 }
 0x50d   :  { %1356 = vrot.lane.b32.xlu0 %v1019_v6, %s1557_s12  ;;  %v1495_v0 = vpop.f32.mrb[11].mxu0 }
 0x53d   :  { %v1185_v7 = vpop.f32.mrb[12].mxu0 }
 0x53e   :  { %1360 = vrot.lane.b32.xlu1 %v1185_v7, %s1556_s11  ;;  %v1505_v8 = vpop.f32.mrb[13].mxu0 }
 0x541   :  { %v1351_v9 = vpop.f32.mrb[14].mxu0 }
 0x542   :  { %1364 = vrot.lane.b32.xlu0 %v1351_v9, %s1555_s10  ;;  %v1515_v10 = vpop.f32.mrb[15].mxu0 }
 0x56f   :  { %v675_v11 = vpop.permute.xlu1 %674 }
 0x570   :  { %v685_v13 = vsel %vm11_vm0, %v1647_v30, %v675_v11 }
 0x573   :  { %v679_v12 = vpop.permute.xlu0 %678 }
 0x574   :  { %v687_v14 = vsel %vm686_vm3, %v685_v13, %v679_v12 }
 0x577   :  { %v683_v15 = vpop.permute.xlu1 %682 }
 0x578   :  { %v689_v16 = vsel %vm688_vm4, %v687_v14, %v683_v15 }
 0x579   :  { %690 = vst [vmem:[%s1720_s1] sm:$0xff] %v689_v16 }
 0x57f   :  { %v1357_v17 = vpop.permute.xlu0 %1356 }
 0x580   :  { %v1367_v19 = vsel %vm11_vm0, %v852_v4, %v1357_v17 }
 0x5b0   :  { %v1361_v18 = vpop.permute.xlu1 %1360 }
 0x5b1   :  { %v1368_v20 = vsel %vm686_vm3, %v1367_v19, %v1361_v18 }
 0x5b4   :  { %v1365_v21 = vpop.permute.xlu0 %1364 }
 0x5b5   :  { %v1369_v22 = vsel %vm688_vm4, %v1368_v20, %v1365_v21 }
 0x5b6   :  { %1403 = vst [vmem:[%s1720_s1 + $0x8] sm:$0xff] %v1369_v22 }

// kernel: encoder_layer_forward.13
= control target key start
LH: loop header
LB: loop body
LE: loop exit
PB: predicated region body
PF: predicated region fallthrough
CT: control target
= control target key end

     0   :  { %s110_s0 = inlined_call_operand.vmem [shape: f32[16,128], index: 0, kind: input, shape index: {}]   ;;  %s111_s1 = inlined_call_operand.vmem [shape: f32[2,128], index: 1, kind: input, shape index: {}]   ;;  %s112_s2 = inlined_call_operand.vmem [shape: f32[1,128], index: 2, kind: input, shape index: {}]   ;;  %s113_s3 = inlined_call_operand.vmem [shape: f32[1,128], index: 3, kind: input, shape index: {}]   ;;  %s114_s4 = inlined_call_operand.vmem [shape: f32[16,128], index: 4, kind: output, shape index: {}]  }
   0x1   :  { %v17_v0 = vld [vmem:[%s110_s0] sm:$0xff]  ;;  %v18_v4 = vld [vmem:[%s110_s0 + $0x8] sm:$0xff] }
   0x2   :  { %v57_v1 = vld [vmem:[%s111_s1] ss:$0 sm:$0xff]  ;;  %v58_v2 = vld [vmem:[%s111_s1 + $0x1] ss:$0 sm:$0xff] }
   0x3   :  { %v25_v3 = vsub.f32 %v17_v0, %v57_v1  ;;  %v59_v5 = vld [vmem:[%s112_s2] ss:$0 sm:$0xff]  ;;  %v26_v6 = vsub.f32 %v18_v4, %v57_v1 }
   0x4   :  { %v60_v8 = vld [vmem:[%s113_s3] ss:$0 sm:$0xff] }
   0x5   :  { %v31_v7 = vmul.f32 %v58_v2, %v25_v3  ;;  %v32_v9 = vmul.f32 %v58_v2, %v26_v6 }
   0x7   :  { %v40_v10 = vmul.f32 %v59_v5, %v31_v7  ;;  %v41_v11 = vmul.f32 %v59_v5, %v32_v9 }
   0x9   :  { %v49_v12 = vadd.f32 %v60_v8, %v40_v10  ;;  %v50_v13 = vadd.f32 %v60_v8, %v41_v11 }
   0xb   :  { %51 = vst [vmem:[%s114_s4] sm:$0xff] %v49_v12  ;;  %52 = vst [vmem:[%s114_s4 + $0x8] sm:$0xff] %v50_v13 }

// kernel: encoder_layer_forward.17
= control target key start
LH: loop header
LB: loop body
LE: loop exit
PB: predicated region body
PF: predicated region fallthrough
CT: control target
= control target key end

     0   :  { %s159_s0 = inlined_call_operand.vmem [shape: f32[16,128], index: 0, kind: input, shape index: {}]   ;;  %s160_s1 = inlined_call_operand.vmem [shape: f32[2,128], index: 1, kind: input, shape index: {}]   ;;  %s161_s2 = inlined_call_operand.vmem [shape: f32[1,128], index: 2, kind: input, shape index: {}]   ;;  %s162_s3 = inlined_call_operand.vmem [shape: f32[1,128], index: 3, kind: input, shape index: {}]   ;;  %s163_s4 = inlined_call_operand.hbm [shape: f32[16,128], index: 4, kind: output, shape index: {}]  }
   0x1   :  { %v18_v0 = vld [vmem:[%s159_s0] sm:$0xff]  ;;  %v19_v4 = vld [vmem:[%s159_s0 + $0x8] sm:$0xff] }
   0x2   :  { %v70_v1 = vld [vmem:[%s160_s1] ss:$0 sm:$0xff]  ;;  %v71_v2 = vld [vmem:[%s160_s1 + $0x1] ss:$0 sm:$0xff] }
   0x3   :  { %v26_v3 = vsub.f32 %v18_v0, %v70_v1  ;;  %v72_v5 = vld [vmem:[%s161_s2] ss:$0 sm:$0xff]  ;;  %v27_v6 = vsub.f32 %v19_v4, %v70_v1 }
   0x4   :  { %9 = vsyncpa [#allocation3], 0  ;;  %v73_v8 = vld [vmem:[%s162_s3] ss:$0 sm:$0xff]  ;;  %s101_s27 = smov [#allocation2]  }
   0x5   :  { %v32_v7 = vmul.f32 %v71_v2, %v26_v3  ;;  %v33_v9 = vmul.f32 %v71_v2, %v27_v6  ;;  %s59_s28 = sshll.u32 %s101_s27, 4  ;;  %s60_s28 = int_to_ptr.vmem [resolvable:$true] %s59_s28 }
   0x6   :  { %s77_s0 = scalar_lea.vmem %s60_s28, 256  ;;  %p82_p1 = scmp.lt.s32.totalorder %s60_s28, %s60_s28 }
   0x7   :  { %v41_v10 = vmul.f32 %v72_v5, %v32_v7  ;;  %v42_v11 = vmul.f32 %v72_v5, %v33_v9  ;;  %p78_p0 = scmp.ne.s32.totalorder %s60_s28, %s77_s0  ;;  %p83_p2 = scmp.lt.s32.totalorder %s77_s0, %s77_s0 }
   0x9   :  { %v50_v12 = vadd.f32 %v73_v8, %v41_v10  ;;  %v51_v13 = vadd.f32 %v73_v8, %v42_v11  ;;  %p84_p3 = por %p83_p2, %p82_p1 }
   0xb   :  { %52 = vst [vmem:[#allocation2] sm:$0xff] %v50_v12  ;;  %53 = vst [vmem:[#allocation2 + $0x8] sm:$0xff] %v51_v13  ;;  %p85_p4 = pnand %p84_p3, %p78_p0 }
   0xd   :  { %88 = shalt.err (!%p85_p4)
}
   0xe   :  { %s89_s3 = scalar_lea.hbm %s163_s4, 256 }
   0xf   :  { %p90_p5 = scmp.ne.s32.totalorder %s163_s4, %s89_s3  ;;  %p93_p6 = scmp.lt.u32.totalorder %s89_s3, %s163_s4 }
  0x11   :  { %p95_p7 = pnand %p93_p6, %p90_p5 }
  0x13   :  { %98 = shalt.err (!%p95_p7)
}
  0x14   :  { %s102_s7 = smov 128   ;;  %s103_s8 = smov 8  }
  0x15   :  { %65 = dma.vmem_to_hbm [thread:$0]  %s60_s28, 256, %s163_s4, [#allocation3], %s102_s7, %s102_s7, %s103_s8  }
  0x16   :  { %99 = dma.done.wait [#allocation3], 256  }
  0x17   :  { %100 = vsyncadd [#allocation3], 4294967040 }
  0x18   :  { %69 = vsyncpa [#allocation3], 1 }

// kernel: encoder_layer_forward.14
= control target key start
LH: loop header
LB: loop body
LE: loop exit
PB: predicated region body
PF: predicated region fallthrough
CT: control target
= control target key end

     0   :  { %s291_s1 = inlined_call_operand.vmem [shape: f32[128,128], index: 1, kind: input, shape index: {}]   ;;  %s292_s0 = inlined_call_operand.vmem [shape: f32[16,128], index: 0, kind: input, shape index: {}]   ;;  %s293_s2 = inlined_call_operand.vmem [shape: f32[1,128], index: 2, kind: input, shape index: {}]   ;;  %s294_s3 = inlined_call_operand.vmem [shape: f32[16,128], index: 3, kind: output, shape index: {}]  }
   0x1   :  { %v16_v0 = vld [vmem:[%s291_s1] sm:$0xff]  ;;  %v17_v1 = vld [vmem:[%s291_s1 + $0x8] sm:$0xff]  ;;  %v18_v2 = vld [vmem:[%s291_s1 + $0x10] sm:$0xff] }
   0x2   :  { %v176_v3 = vpack.c.bf16 %v17_v1, %v16_v0  ;;  %v19_v4 = vld [vmem:[%s291_s1 + $0x18] sm:$0xff]  ;;  %v20_v6 = vld [vmem:[%s291_s1 + $0x20] sm:$0xff]  ;;  %v21_v7 = vld [vmem:[%s291_s1 + $0x28] sm:$0xff] }
   0x3   :  { %v180_v5 = vpack.c.bf16 %v19_v4, %v18_v2  ;;  %v184_v8 = vpack.c.bf16 %v21_v7, %v20_v6  ;;  %v14_v9 = vld [vmem:[%s292_s0] sm:$0xff]  ;;  %v22_v10 = vld [vmem:[%s291_s1 + $0x30] sm:$0xff]  ;;  %v23_v11 = vld [vmem:[%s291_s1 + $0x38] sm:$0xff] }
   0x4   :  { %177 = vmatprep.subr.bf16.mxu0 %v176_v3  ;;  %173 = vmatprep.mubr.f32.mxu0 %v14_v9  ;;  %v188_v12 = vpack.c.bf16 %v23_v11, %v22_v10  ;;  %v24_v13 = vld [vmem:[%s291_s1 + $0x40] sm:$0xff]  ;;  %v25_v14 = vld [vmem:[%s291_s1 + $0x48] sm:$0xff]  ;;  %v26_v16 = vld [vmem:[%s291_s1 + $0x50] sm:$0xff] }
   0x5   :  { %179 = vmatpush3.bf16.msra.mxu0 %v176_v3  ;;  %v192_v15 = vpack.c.bf16 %v25_v14, %v24_v13  ;;  %v27_v17 = vld [vmem:[%s291_s1 + $0x58] sm:$0xff]  ;;  %v28_v19 = vld [vmem:[%s291_s1 + $0x60] sm:$0xff]  ;;  %v29_v20 = vld [vmem:[%s291_s1 + $0x68] sm:$0xff] }
   0x6   :  { %181 = vmatprep.subr.bf16.mxu0 %v180_v5  ;;  %v196_v18 = vpack.c.bf16 %v27_v17, %v26_v16  ;;  %v200_v21 = vpack.c.bf16 %v29_v20, %v28_v19  ;;  %v30_v22 = vld [vmem:[%s291_s1 + $0x70] sm:$0xff]  ;;  %v31_v23 = vld [vmem:[%s291_s1 + $0x78] sm:$0xff]  ;;  %v15_v25 = vld [vmem:[%s292_s0 + $0x8] sm:$0xff] }
   0x7   :  { %v204_v24 = vpack.c.bf16 %v31_v23, %v30_v22  ;;  %v122_v26 = vld [vmem:[%s293_s2] ss:$0 sm:$0xff] }
   0x9   :  { %183 = vmatpush3.bf16.msra.mxu0 %v180_v5 }
   0xa   :  { %185 = vmatprep.subr.bf16.mxu0 %v184_v8 }
   0xd   :  { %187 = vmatpush3.bf16.msra.mxu0 %v184_v8 }
   0xe   :  { %189 = vmatprep.subr.bf16.mxu0 %v188_v12 }
  0x11   :  { %191 = vmatpush3.bf16.msra.mxu0 %v188_v12 }
  0x12   :  { %193 = vmatprep.subr.bf16.mxu0 %v192_v15 }
  0x15   :  { %195 = vmatpush3.bf16.msra.mxu0 %v192_v15 }
  0x16   :  { %197 = vmatprep.subr.bf16.mxu0 %v196_v18 }
  0x19   :  { %199 = vmatpush3.bf16.msra.mxu0 %v196_v18 }
  0x1a   :  { %201 = vmatprep.subr.bf16.mxu0 %v200_v21 }
  0x1d   :  { %203 = vmatpush3.bf16.msra.mxu0 %v200_v21 }
  0x1e   :  { %205 = vmatprep.subr.bf16.mxu0 %v204_v24 }
  0x21   :  { %207 = vmatpush3.bf16.msra.mxu0 %v204_v24 }
  0x24   :  { %174 = vmatmul.mubr.f32.vlgmr.msra.gmra.mrb[0].mxu0 %v15_v25 }
  0xf7   :  { %v175_v27 = vpop.f32.mrb[0].mxu0 }
  0xf8   :  { %v111_v28 = vadd.f32 %v175_v27, %v122_v26  ;;  %v105_v29 = vpop.f32.mrb[1].mxu0 }
  0xf9   :  { %v106_v30 = vadd.f32 %v122_v26, %v105_v29 }
  0xfa   :  { %v115_v31 = vmax.f32 %v111_v28, 0.0 }
  0xfb   :  { %v114_v32 = vmax.f32 %v106_v30, 0.0 }
  0xfc   :  { %117 = vst [vmem:[%s294_s3 + $0x8] sm:$0xff] %v115_v31 }
  0xfd   :  { %116 = vst [vmem:[%s294_s3] sm:$0xff] %v114_v32 }

</bundles_post_ra>
